<compile_context>
chip_gen: v5e
topology: v5e:2x2
jax: 0.10.0
libtpu: 0.0.40
codegen_flags: <defaults>
</compile_context>

<pallas_src>
import functools

import jax
import jax.numpy as jnp
from jax.experimental import pallas as pl
from jax.experimental.pallas import tpu as pltpu

# Layer sizes from the PyTorch module.
LAYER_DIMS = [11, 64, 128, 64, 6, 32, 64, 12]
P = 128        # padded layer width (max of LAYER_DIMS)
F_PAD = 16     # input features padded 11 -> 16 (sublane-friendly contraction)
ALIGN = 256    # batch-tile alignment: full MXU lane width on v6e/v7x


def _round_up(n, m):
    return ((n + m - 1) // m) * m


def _mlp_kernel(x_ref, w_ref, b_ref, out_ref):
    """Feature-major MLP block (batch on the lane axis).

    x_ref:   [F_PAD, TB]   float32
    w_ref:   [L, 128, 128] bfloat16  (PyTorch [out, in], zero-padded)
    b_ref:   [L, 128, 1]   float32   (zero-padded)
    out_ref: [12, TB]      float32
    """
    n_layers = w_ref.shape[0]
    k0 = x_ref.shape[0]

    # Layer 0: contract only over the (padded-to-16) input features; the
    # zero-padded weight columns/rows keep the padded lanes/rows exactly 0.
    h = jnp.dot(w_ref[0, :, :k0], x_ref[...].astype(jnp.bfloat16),
                preferred_element_type=jnp.float32)
    h = jnp.maximum(h + b_ref[0], 0.0)

    # Hidden layers (uniform padded 128x128 weights, lane-dense N = TB).
    for l in range(1, n_layers - 1):
        h = jnp.dot(w_ref[l], h.astype(jnp.bfloat16),
                    preferred_element_type=jnp.float32)
        h = jnp.maximum(h + b_ref[l], 0.0)

    # Final layer: no ReLU; only the first 12 output rows are valid.
    h = jnp.dot(w_ref[n_layers - 1], h.astype(jnp.bfloat16),
                preferred_element_type=jnp.float32) + b_ref[n_layers - 1]
    out_ref[...] = h[:out_ref.shape[0], :]


def init_params(key):
    """PyTorch nn.Linear default init U(-1/sqrt(in), 1/sqrt(in)); [out, in] weights."""
    params = []
    for i in range(len(LAYER_DIMS) - 1):
        fan_in, fan_out = LAYER_DIMS[i], LAYER_DIMS[i + 1]
        key, kw, kb = jax.random.split(key, 3)
        bound = 1.0 / (fan_in ** 0.5)
        w = jax.random.uniform(kw, (fan_out, fan_in), jnp.float32, -bound, bound)
        b = jax.random.uniform(kb, (fan_out,), jnp.float32, -bound, bound)
        params.append((w, b))
    return params


def pack_params(params):
    """Zero-pad every layer to [P, P] / [P, 1] and stack into two buffers:
    one bf16 weight stack and one f32 bias stack (done once, outside jit)."""
    n = len(params)
    w_stack = jnp.zeros((n, P, P), jnp.float32)
    b_stack = jnp.zeros((n, P, 1), jnp.float32)
    for l, (w, b) in enumerate(params):
        o, i = w.shape
        w_stack = w_stack.at[l, :o, :i].set(w)
        b_stack = b_stack.at[l, :o, 0].set(b)
    return w_stack.astype(jnp.bfloat16), b_stack


@functools.partial(jax.jit, static_argnames=("tb",))
def discriminator_forward(x, w_stack, b_stack, tb=1024):
    """x: [B, 11] float32 -> [B, 12] float32."""
    B, F = x.shape
    assert F == LAYER_DIMS[0], (B, F)
    out_dim = LAYER_DIMS[-1]

    # ---- batch tiling (static Python shape math) ---------------------------
    tb_r = max(ALIGN, (int(tb) // ALIGN) * ALIGN)      # 256-aligned tile cap
    steps = pl.cdiv(B, tb_r)
    if B > ALIGN:
        steps = max(steps, 2)                          # >=2 steps -> v7x megacore
    TB = _round_up(pl.cdiv(B, steps), ALIGN)           # lane-dense, multiple of 256
    Bp = steps * TB                                    # padding < ALIGN per step

    # ---- feature-major input: [F_PAD, Bp], batch on the lane axis ----------
    # Zero-pad batch (B -> Bp) and features (11 -> 16); fuses with the transpose.
    xt = jnp.pad(x, ((0, Bp - B), (0, F_PAD - F))).T

    x_spec = pl.BlockSpec((F_PAD, TB), lambda i: (0, i))
    w_spec = pl.BlockSpec(w_stack.shape, lambda i: (0, 0, 0))   # VMEM-resident
    b_spec = pl.BlockSpec(b_stack.shape, lambda i: (0, 0, 0))   # VMEM-resident
    out_spec = pl.BlockSpec((out_dim, TB), lambda i: (0, i))

    flops = 2 * Bp * sum(LAYER_DIMS[i] * LAYER_DIMS[i + 1]
                         for i in range(len(LAYER_DIMS) - 1))
    bytes_accessed = (Bp * (F_PAD + out_dim) * 4
                      + w_stack.size * w_stack.dtype.itemsize
                      + b_stack.size * b_stack.dtype.itemsize)

    yt = pl.pallas_call(
        _mlp_kernel,
        out_shape=jax.ShapeDtypeStruct((out_dim, Bp), jnp.float32),
        grid_spec=pltpu.PrefetchScalarGridSpec(
            num_scalar_prefetch=0,
            grid=(steps,),
            in_specs=[x_spec, w_spec, b_spec],
            out_specs=out_spec,
        ),
        compiler_params=pltpu.CompilerParams(
            dimension_semantics=("parallel",)),
        cost_estimate=pl.CostEstimate(
            flops=flops, transcendentals=0, bytes_accessed=bytes_accessed),
    )(xt, w_stack, b_stack)

    # Un-pad + transpose back to [B, 12] (fused into one copy by XLA).
    return yt[:, :B].T


def reference_forward_f32(x, params):
    """Pure-JAX f32 reference (PyTorch semantics)."""
    h = x
    for i, (w, b) in enumerate(params):
        h = h @ w.T + b
        if i != len(params) - 1:
            h = jnp.maximum(h, 0.0)
    return h


def reference_forward_bf16(x, params):
    """Reference with the same bf16-matmul / f32-accumulate numerics as the kernel."""
    h = x
    for i, (w, b) in enumerate(params):
        h = jnp.dot(h.astype(jnp.bfloat16), w.astype(jnp.bfloat16).T,
                    preferred_element_type=jnp.float32) + b
        if i != len(params) - 1:
            h = jnp.maximum(h, 0.0)
    return h


if __name__ == "__main__":
    key = jax.random.PRNGKey(0)
    k_params, k_x1, k_x2 = jax.random.split(key, 3)

    params = init_params(k_params)
    w_stack, b_stack = pack_params(params)

    # B=37: small ragged batch (single grid step); B=600: multi-step grid path.
    for B, kx in ((37, k_x1), (600, k_x2)):
        x = jax.random.normal(kx, (B, LAYER_DIMS[0]), jnp.float32)

        out = jax.block_until_ready(discriminator_forward(x, w_stack, b_stack))
        assert out.shape == (B, LAYER_DIMS[-1]), out.shape

        # Tight check vs. a reference using identical bf16-matmul numerics.
        ref_bf16 = reference_forward_bf16(x, params)
        assert jnp.allclose(out, ref_bf16, atol=2e-3, rtol=2e-3), \
            f"mismatch vs bf16 reference at B={B}"

        # Looser check vs. the pure-f32 PyTorch-equivalent reference.
        ref_f32 = reference_forward_f32(x, params)
        assert jnp.allclose(out, ref_f32, atol=5e-2, rtol=5e-2), \
            f"mismatch vs f32 reference at B={B}"

    print("KERNEL_OK")
</pallas_src>

<mosaic_0001>
module attributes {stable_mosaic.version = 11 : i64} {
  func.func @_mlp_kernel(%arg0: i32, %arg1: memref<16x256xf32, #tpu.memory_space<vmem>>, %arg2: memref<7x128x128xbf16, #tpu.memory_space<vmem>>, %arg3: memref<7x128x1xf32, #tpu.memory_space<vmem>>, %arg4: memref<12x256xf32, #tpu.memory_space<vmem>>) attributes {dimension_semantics = [#tpu.dimension_semantics<parallel>], iteration_bounds = array<i64: 1>, scalar_prefetch = 0 : i64, scratch_operands = 0 : i64, tpu.core_type = #tpu.core_type<tc>, window_params = [{transform_indices = @transform_0, window_bounds = array<i64: 16, 256>}, {pipeline_mode = #tpu.pipeline_mode<synchronous>, transform_indices = @transform_1, window_bounds = array<i64: 7, 128, 128>}, {pipeline_mode = #tpu.pipeline_mode<synchronous>, transform_indices = @transform_2, window_bounds = array<i64: 7, 128, 1>}, {transform_indices = @transform_3, window_bounds = array<i64: 12, 256>}]} {
    %c0 = arith.constant 0 : index
    %c0_0 = arith.constant 0 : index
    %c0_1 = arith.constant 0 : index
    %0 = vector.load %arg2[%c0, %c0_0, %c0_1] : memref<7x128x128xbf16, #tpu.memory_space<vmem>>, vector<1x128x16xbf16>
    %1 = vector.shape_cast %0 : vector<1x128x16xbf16> to vector<128x16xbf16>
    %c0_2 = arith.constant 0 : index
    %c0_3 = arith.constant 0 : index
    %2 = vector.load %arg1[%c0_2, %c0_3] : memref<16x256xf32, #tpu.memory_space<vmem>>, vector<16x256xf32>
    %3 = arith.truncf %2 : vector<16x256xf32> to vector<16x256xbf16>
    %cst = arith.constant dense<0.000000e+00> : vector<128x256xf32>
    %4 = tpu.matmul %1, %3, %cst {dimension_numbers = #tpu.dot_dimension_numbers<[1], [0], [0], [1], [0, 0, 1, 1], [], []>} : vector<128x16xbf16>, vector<16x256xbf16>, vector<128x256xf32> -> vector<128x256xf32>
    %c0_4 = arith.constant 0 : index
    %c0_5 = arith.constant 0 : index
    %c0_6 = arith.constant 0 : index
    %5 = vector.load %arg3[%c0_4, %c0_5, %c0_6] : memref<7x128x1xf32, #tpu.memory_space<vmem>>, vector<1x128x1xf32>
    %6 = vector.shape_cast %5 : vector<1x128x1xf32> to vector<128x1xf32>
    %7 = vector.broadcast %6 : vector<128x1xf32> to vector<128x256xf32>
    %8 = arith.addf %4, %7 : vector<128x256xf32>
    %cst_7 = arith.constant 0.000000e+00 : f32
    %9 = vector.broadcast %cst_7 : f32 to vector<128x256xf32>
    %10 = arith.maximumf %8, %9 : vector<128x256xf32>
    %c1 = arith.constant 1 : index
    %c0_8 = arith.constant 0 : index
    %c0_9 = arith.constant 0 : index
    %11 = vector.load %arg2[%c1, %c0_8, %c0_9] : memref<7x128x128xbf16, #tpu.memory_space<vmem>>, vector<1x128x128xbf16>
    %12 = vector.shape_cast %11 : vector<1x128x128xbf16> to vector<128x128xbf16>
    %13 = arith.truncf %10 : vector<128x256xf32> to vector<128x256xbf16>
    %cst_10 = arith.constant dense<0.000000e+00> : vector<128x256xf32>
    %14 = tpu.matmul %12, %13, %cst_10 {dimension_numbers = #tpu.dot_dimension_numbers<[1], [0], [0], [1], [0, 0, 1, 1], [], []>} : vector<128x128xbf16>, vector<128x256xbf16>, vector<128x256xf32> -> vector<128x256xf32>
    %c1_11 = arith.constant 1 : index
    %c0_12 = arith.constant 0 : index
    %c0_13 = arith.constant 0 : index
    %15 = vector.load %arg3[%c1_11, %c0_12, %c0_13] : memref<7x128x1xf32, #tpu.memory_space<vmem>>, vector<1x128x1xf32>
    %16 = vector.shape_cast %15 : vector<1x128x1xf32> to vector<128x1xf32>
    %17 = vector.broadcast %16 : vector<128x1xf32> to vector<128x256xf32>
    %18 = arith.addf %14, %17 : vector<128x256xf32>
    %cst_14 = arith.constant 0.000000e+00 : f32
    %19 = vector.broadcast %cst_14 : f32 to vector<128x256xf32>
    %20 = arith.maximumf %18, %19 : vector<128x256xf32>
    %c2 = arith.constant 2 : index
    %c0_15 = arith.constant 0 : index
    %c0_16 = arith.constant 0 : index
    %21 = vector.load %arg2[%c2, %c0_15, %c0_16] : memref<7x128x128xbf16, #tpu.memory_space<vmem>>, vector<1x128x128xbf16>
    %22 = vector.shape_cast %21 : vector<1x128x128xbf16> to vector<128x128xbf16>
    %23 = arith.truncf %20 : vector<128x256xf32> to vector<128x256xbf16>
    %cst_17 = arith.constant dense<0.000000e+00> : vector<128x256xf32>
    %24 = tpu.matmul %22, %23, %cst_17 {dimension_numbers = #tpu.dot_dimension_numbers<[1], [0], [0], [1], [0, 0, 1, 1], [], []>} : vector<128x128xbf16>, vector<128x256xbf16>, vector<128x256xf32> -> vector<128x256xf32>
    %c2_18 = arith.constant 2 : index
    %c0_19 = arith.constant 0 : index
    %c0_20 = arith.constant 0 : index
    %25 = vector.load %arg3[%c2_18, %c0_19, %c0_20] : memref<7x128x1xf32, #tpu.memory_space<vmem>>, vector<1x128x1xf32>
    %26 = vector.shape_cast %25 : vector<1x128x1xf32> to vector<128x1xf32>
    %27 = vector.broadcast %26 : vector<128x1xf32> to vector<128x256xf32>
    %28 = arith.addf %24, %27 : vector<128x256xf32>
    %cst_21 = arith.constant 0.000000e+00 : f32
    %29 = vector.broadcast %cst_21 : f32 to vector<128x256xf32>
    %30 = arith.maximumf %28, %29 : vector<128x256xf32>
    %c3 = arith.constant 3 : index
    %c0_22 = arith.constant 0 : index
    %c0_23 = arith.constant 0 : index
    %31 = vector.load %arg2[%c3, %c0_22, %c0_23] : memref<7x128x128xbf16, #tpu.memory_space<vmem>>, vector<1x128x128xbf16>
    %32 = vector.shape_cast %31 : vector<1x128x128xbf16> to vector<128x128xbf16>
    %33 = arith.truncf %30 : vector<128x256xf32> to vector<128x256xbf16>
    %cst_24 = arith.constant dense<0.000000e+00> : vector<128x256xf32>
    %34 = tpu.matmul %32, %33, %cst_24 {dimension_numbers = #tpu.dot_dimension_numbers<[1], [0], [0], [1], [0, 0, 1, 1], [], []>} : vector<128x128xbf16>, vector<128x256xbf16>, vector<128x256xf32> -> vector<128x256xf32>
    %c3_25 = arith.constant 3 : index
    %c0_26 = arith.constant 0 : index
    %c0_27 = arith.constant 0 : index
    %35 = vector.load %arg3[%c3_25, %c0_26, %c0_27] : memref<7x128x1xf32, #tpu.memory_space<vmem>>, vector<1x128x1xf32>
    %36 = vector.shape_cast %35 : vector<1x128x1xf32> to vector<128x1xf32>
    %37 = vector.broadcast %36 : vector<128x1xf32> to vector<128x256xf32>
    %38 = arith.addf %34, %37 : vector<128x256xf32>
    %cst_28 = arith.constant 0.000000e+00 : f32
    %39 = vector.broadcast %cst_28 : f32 to vector<128x256xf32>
    %40 = arith.maximumf %38, %39 : vector<128x256xf32>
    %c4 = arith.constant 4 : index
    %c0_29 = arith.constant 0 : index
    %c0_30 = arith.constant 0 : index
    %41 = vector.load %arg2[%c4, %c0_29, %c0_30] : memref<7x128x128xbf16, #tpu.memory_space<vmem>>, vector<1x128x128xbf16>
    %42 = vector.shape_cast %41 : vector<1x128x128xbf16> to vector<128x128xbf16>
    %43 = arith.truncf %40 : vector<128x256xf32> to vector<128x256xbf16>
    %cst_31 = arith.constant dense<0.000000e+00> : vector<128x256xf32>
    %44 = tpu.matmul %42, %43, %cst_31 {dimension_numbers = #tpu.dot_dimension_numbers<[1], [0], [0], [1], [0, 0, 1, 1], [], []>} : vector<128x128xbf16>, vector<128x256xbf16>, vector<128x256xf32> -> vector<128x256xf32>
    %c4_32 = arith.constant 4 : index
    %c0_33 = arith.constant 0 : index
    %c0_34 = arith.constant 0 : index
    %45 = vector.load %arg3[%c4_32, %c0_33, %c0_34] : memref<7x128x1xf32, #tpu.memory_space<vmem>>, vector<1x128x1xf32>
    %46 = vector.shape_cast %45 : vector<1x128x1xf32> to vector<128x1xf32>
    %47 = vector.broadcast %46 : vector<128x1xf32> to vector<128x256xf32>
    %48 = arith.addf %44, %47 : vector<128x256xf32>
    %cst_35 = arith.constant 0.000000e+00 : f32
    %49 = vector.broadcast %cst_35 : f32 to vector<128x256xf32>
    %50 = arith.maximumf %48, %49 : vector<128x256xf32>
    %c5 = arith.constant 5 : index
    %c0_36 = arith.constant 0 : index
    %c0_37 = arith.constant 0 : index
    %51 = vector.load %arg2[%c5, %c0_36, %c0_37] : memref<7x128x128xbf16, #tpu.memory_space<vmem>>, vector<1x128x128xbf16>
    %52 = vector.shape_cast %51 : vector<1x128x128xbf16> to vector<128x128xbf16>
    %53 = arith.truncf %50 : vector<128x256xf32> to vector<128x256xbf16>
    %cst_38 = arith.constant dense<0.000000e+00> : vector<128x256xf32>
    %54 = tpu.matmul %52, %53, %cst_38 {dimension_numbers = #tpu.dot_dimension_numbers<[1], [0], [0], [1], [0, 0, 1, 1], [], []>} : vector<128x128xbf16>, vector<128x256xbf16>, vector<128x256xf32> -> vector<128x256xf32>
    %c5_39 = arith.constant 5 : index
    %c0_40 = arith.constant 0 : index
    %c0_41 = arith.constant 0 : index
    %55 = vector.load %arg3[%c5_39, %c0_40, %c0_41] : memref<7x128x1xf32, #tpu.memory_space<vmem>>, vector<1x128x1xf32>
    %56 = vector.shape_cast %55 : vector<1x128x1xf32> to vector<128x1xf32>
    %57 = vector.broadcast %56 : vector<128x1xf32> to vector<128x256xf32>
    %58 = arith.addf %54, %57 : vector<128x256xf32>
    %cst_42 = arith.constant 0.000000e+00 : f32
    %59 = vector.broadcast %cst_42 : f32 to vector<128x256xf32>
    %60 = arith.maximumf %58, %59 : vector<128x256xf32>
    %c6 = arith.constant 6 : index
    %c0_43 = arith.constant 0 : index
    %c0_44 = arith.constant 0 : index
    %61 = vector.load %arg2[%c6, %c0_43, %c0_44] : memref<7x128x128xbf16, #tpu.memory_space<vmem>>, vector<1x128x128xbf16>
    %62 = vector.shape_cast %61 : vector<1x128x128xbf16> to vector<128x128xbf16>
    %63 = arith.truncf %60 : vector<128x256xf32> to vector<128x256xbf16>
    %cst_45 = arith.constant dense<0.000000e+00> : vector<128x256xf32>
    %64 = tpu.matmul %62, %63, %cst_45 {dimension_numbers = #tpu.dot_dimension_numbers<[1], [0], [0], [1], [0, 0, 1, 1], [], []>} : vector<128x128xbf16>, vector<128x256xbf16>, vector<128x256xf32> -> vector<128x256xf32>
    %c6_46 = arith.constant 6 : index
    %c0_47 = arith.constant 0 : index
    %c0_48 = arith.constant 0 : index
    %65 = vector.load %arg3[%c6_46, %c0_47, %c0_48] : memref<7x128x1xf32, #tpu.memory_space<vmem>>, vector<1x128x1xf32>
    %66 = vector.shape_cast %65 : vector<1x128x1xf32> to vector<128x1xf32>
    %67 = vector.broadcast %66 : vector<128x1xf32> to vector<128x256xf32>
    %68 = arith.addf %64, %67 : vector<128x256xf32>
    %69 = vector.extract_strided_slice %68 {offsets = [0, 0], sizes = [12, 256], strides = [1, 1]} : vector<128x256xf32> to vector<12x256xf32>
    %c0_49 = arith.constant 0 : index
    %c0_50 = arith.constant 0 : index
    %70 = vector.load %arg4[%c0_49, %c0_50] : memref<12x256xf32, #tpu.memory_space<vmem>>, vector<12x256xf32>
    tpu.vector_store %arg4[%c0_49, %c0_50], %69 {strides = array<i32>} : memref<12x256xf32, #tpu.memory_space<vmem>>, vector<12x256xf32>,
    return
  }
  func.func @transform_0(%arg0: i32) -> (i32, i32) {
    %c0_i32 = arith.constant 0 : i32
    %c0_i32_0 = arith.constant 0 : i32
    return %c0_i32, %arg0 : i32, i32
  }
  func.func @transform_1(%arg0: i32) -> (i32, i32, i32) {
    %c0_i32 = arith.constant 0 : i32
    %c0_i32_0 = arith.constant 0 : i32
    %c0_i32_1 = arith.constant 0 : i32
    %c0_i32_2 = arith.constant 0 : i32
    return %c0_i32, %c0_i32_0, %c0_i32_1 : i32, i32, i32
  }
  func.func @transform_2(%arg0: i32) -> (i32, i32, i32) {
    %c0_i32 = arith.constant 0 : i32
    %c0_i32_0 = arith.constant 0 : i32
    %c0_i32_1 = arith.constant 0 : i32
    %c0_i32_2 = arith.constant 0 : i32
    return %c0_i32, %c0_i32_0, %c0_i32_1 : i32, i32, i32
  }
  func.func @transform_3(%arg0: i32) -> (i32, i32) {
    %c0_i32 = arith.constant 0 : i32
    %c0_i32_0 = arith.constant 0 : i32
    return %c0_i32, %arg0 : i32, i32
  }
}

</mosaic_0001>

<bundles_post_ra>
// kernel: discriminator_forward.1
= control target key start
LH: loop header
LB: loop body
LE: loop exit
PB: predicated region body
PF: predicated region fallthrough
CT: control target
= control target key end

     0   :  { %v2612_v0 = vmov 0   ;;  %vm173_vm0 = vcmask 130048   ;;  %s3450_s2 = inlined_call_operand.vmem [shape: f32[7,128,1], index: 2, kind: input, shape index: {}]   ;;  %s3451_s0 = inlined_call_operand.vmem [shape: f32[16,256], index: 0, kind: input, shape index: {}]   ;;  %s3452_s1 = inlined_call_operand.vmem [shape: bf16[7,128,128], index: 1, kind: input, shape index: {}]   ;;  %s3453_s3 = inlined_call_operand.vmem [shape: f32[12,256], index: 3, kind: output, shape index: {}]  }
   0x1   :  { %2611 = vset.pattern.permute.xlu2 %v2612_v0  ;;  %2610 = vset.pattern.permute.xlu1 %v2612_v0  ;;  %v51_v1 = vld [vmem:[%s3450_s2 + $0x70] sm:$0xff]  ;;  %v49_v2 = vld [vmem:[%s3450_s2 + $0x60] sm:$0xff]  ;;  %v32_v6 = vld [vmem:[%s3451_s0 + $0x8] sm:$0xff] }
   0x2   :  { %v47_v3 = vld [vmem:[%s3450_s2 + $0x50] sm:$0xff]  ;;  %2609 = vset.pattern.permute.xlu0 %v2612_v0  ;;  %115 = vperm.xlu1 %2610, %v49_v2   ;;  %v31_v4 = vld [vmem:[%s3451_s0] sm:$0xff]  ;;  %v34_v8 = vld [vmem:[%s3451_s0 + $0x18] sm:$0xff] }
   0x3   :  { %v33_v5 = vld [vmem:[%s3451_s0 + $0x10] sm:$0xff]  ;;  %125 = vperm.xlu0 %2609, %v51_v1   ;;  %105 = vperm.xlu2 %2611, %v47_v3   ;;  %v36_v9 = vpack.c.bf16 %v34_v8, %v32_v6  ;;  %v2542_v10 = vld [vmem:[%s3452_s1] sm:$0xff]  ;;  %v2547_v11 = vld [vmem:[%s3452_s1 + $0x28] sm:$0xff] }
   0x4   :  { %v35_v7 = vpack.c.bf16 %v33_v5, %v31_v4  ;;  %v2663_v12 = vld [vmem:[%s3452_s1 + $0x20] sm:$0xff]  ;;  %v50_v13 = vld [vmem:[%s3450_s2 + $0x68] sm:$0xff]  ;;  %v52_v14 = vld [vmem:[%s3450_s2 + $0x78] sm:$0xff] }
   0x5   :  { %254 = vmatpush.bf16.msra.mxu1 %v36_v9  ;;  %2599 = vmatpush.bf16.msra.mxu3 %v36_v9  ;;  %v48_v15 = vld [vmem:[%s3450_s2 + $0x58] sm:$0xff]  ;;  %v46_v16 = vld [vmem:[%s3450_s2 + $0x48] sm:$0xff]  ;;  %v45_v17 = vld [vmem:[%s3450_s2 + $0x40] sm:$0xff] }
   0x6   :  { %205 = vmatpush.bf16.msra.mxu0 %v35_v7  ;;  %2598 = vmatpush.bf16.msra.mxu2 %v35_v7  ;;  %v43_v18 = vld [vmem:[%s3450_s2 + $0x30] sm:$0xff]  ;;  %v2543_v19 = vld [vmem:[%s3452_s1 + $0x8] sm:$0xff]  ;;  %v41_v21 = vld [vmem:[%s3450_s2 + $0x20] sm:$0xff] }
   0x7   :  { %v2548_v20 = vld [vmem:[%s3452_s1 + $0x30] sm:$0xff]  ;;  %v44_v22 = vld [vmem:[%s3450_s2 + $0x38] sm:$0xff]  ;;  %v42_v23 = vld [vmem:[%s3450_s2 + $0x28] sm:$0xff] }
   0x8   :  { %2150 = vmatmul.msk.bf16.vlgmr.msra.gmra.mxu1 %vm173_vm0, %v2542_v10  ;;  %2154 = vmatmul.msk.bf16.vlgmr.msra.gmra.mxu3 %vm173_vm0, %v2663_v12  ;;  %v40_v24 = vld [vmem:[%s3450_s2 + $0x18] sm:$0xff]  ;;  %v39_v25 = vld [vmem:[%s3450_s2 + $0x10] sm:$0xff]  ;;  %v37_v26 = vld [vmem:[%s3450_s2] sm:$0xff] }
   0x9   :  { %2142 = vmatmul.msk.bf16.vlgmr.msra.gmra.mxu0 %vm173_vm0, %v2542_v10  ;;  %2147 = vmatmul.msk.bf16.vlgmr.msra.gmra.mxu2 %vm173_vm0, %v2547_v11  ;;  %v2544_v27 = vld [vmem:[%s3452_s1 + $0x10] sm:$0xff]  ;;  %v2549_v28 = vld [vmem:[%s3452_s1 + $0x38] sm:$0xff]  ;;  %v38_v30 = vld [vmem:[%s3450_s2 + $0x8] sm:$0xff] }
   0xa   :  { %120 = vperm.xlu1 %2610, %v50_v13   ;;  %v2188_v29 = vld [vmem:[%s3450_s2 + $0xf0] sm:$0xff]  ;;  %v2189_v31 = vld [vmem:[%s3450_s2 + $0xf8] sm:$0xff]  ;;  %v2187_v32 = vld [vmem:[%s3450_s2 + $0xe8] sm:$0xff] }
   0xb   :  { %130 = vperm.xlu0 %2609, %v52_v14   ;;  %110 = vperm.xlu2 %2611, %v48_v15   ;;  %v2186_v33 = vld [vmem:[%s3450_s2 + $0xe0] sm:$0xff]  ;;  %v2184_v34 = vld [vmem:[%s3450_s2 + $0xd0] sm:$0xff]  ;;  %v2545_v35 = vld [vmem:[%s3452_s1 + $0x18] sm:$0xff] }
   0xc   :  { %v2182_v36 = vld [vmem:[%s3450_s2 + $0xc0] sm:$0xff]  ;;  %v2185_v37 = vld [vmem:[%s3450_s2 + $0xd8] sm:$0xff]  ;;  %v2183_v38 = vld [vmem:[%s3450_s2 + $0xc8] sm:$0xff] }
   0xd   :  { %v2181_v39 = vld [vmem:[%s3450_s2 + $0xb8] sm:$0xff]  ;;  %v2180_v40 = vld [vmem:[%s3450_s2 + $0xb0] sm:$0xff]  ;;  %v2178_v41 = vld [vmem:[%s3450_s2 + $0xa0] sm:$0xff] }
   0xe   :  { %v2176_v42 = vld [vmem:[%s3450_s2 + $0x90] sm:$0xff]  ;;  %v2179_v43 = vld [vmem:[%s3450_s2 + $0xa8] sm:$0xff]  ;;  %v2177_v44 = vld [vmem:[%s3450_s2 + $0x98] sm:$0xff] }
   0xf   :  { %v2175_v45 = vld [vmem:[%s3450_s2 + $0x88] sm:$0xff]  ;;  %v2174_v46 = vld [vmem:[%s3450_s2 + $0x80] sm:$0xff]  ;;  %v2252_v47 = vld [vmem:[%s3450_s2 + $0x170] sm:$0xff] }
  0x10   :  { %v2250_v48 = vld [vmem:[%s3450_s2 + $0x160] sm:$0xff]  ;;  %v2253_v49 = vld [vmem:[%s3450_s2 + $0x178] sm:$0xff]  ;;  %v2251_v50 = vld [vmem:[%s3450_s2 + $0x168] sm:$0xff] }
  0x11   :  { %v2249_v51 = vld [vmem:[%s3450_s2 + $0x158] sm:$0xff]  ;;  %v2248_v52 = vld [vmem:[%s3450_s2 + $0x150] sm:$0xff]  ;;  %v2246_v53 = vld [vmem:[%s3450_s2 + $0x140] sm:$0xff] }
  0x12   :  { %100 = vperm.xlu1 %2610, %v46_v16   ;;  %v2244_v54 = vld [vmem:[%s3450_s2 + $0x130] sm:$0xff]  ;;  %v2247_v55 = vld [vmem:[%s3450_s2 + $0x148] sm:$0xff]  ;;  %v2245_v56 = vld [vmem:[%s3450_s2 + $0x138] sm:$0xff] }
  0x13   :  { %95 = vperm.xlu0 %2609, %v45_v17   ;;  %85 = vperm.xlu2 %2611, %v43_v18   ;;  %v2243_v57 = vld [vmem:[%s3450_s2 + $0x128] sm:$0xff]  ;;  %v2242_v58 = vld [vmem:[%s3450_s2 + $0x120] sm:$0xff]  ;;  %v2240_v59 = vld [vmem:[%s3450_s2 + $0x110] sm:$0xff] }
  0x14   :  { %v2238_v60 = vld [vmem:[%s3450_s2 + $0x100] sm:$0xff]  ;;  %v2241_v61 = vld [vmem:[%s3450_s2 + $0x118] sm:$0xff]  ;;  %v2239_v62 = vld [vmem:[%s3450_s2 + $0x108] sm:$0xff] }
  0x15   :  { %v2317_v63 = vld [vmem:[%s3450_s2 + $0x1f8] sm:$0xff]  ;;  %v2316_v0 = vld [vmem:[%s3450_s2 + $0x1f0] sm:$0xff]  ;;  %v2314_v1 = vld [vmem:[%s3450_s2 + $0x1e0] sm:$0xff] }
  0x16   :  { %v2312_v3 = vld [vmem:[%s3450_s2 + $0x1d0] sm:$0xff]  ;;  %v2315_v5 = vld [vmem:[%s3450_s2 + $0x1e8] sm:$0xff]  ;;  %v2313_v6 = vld [vmem:[%s3450_s2 + $0x1d8] sm:$0xff] }
  0x17   :  { %v2311_v10 = vld [vmem:[%s3450_s2 + $0x1c8] sm:$0xff]  ;;  %v2306_v17 = vld [vmem:[%s3450_s2 + $0x1a0] sm:$0xff]  ;;  %v2309_v18 = vld [vmem:[%s3450_s2 + $0x1b8] sm:$0xff] }
  0x18   :  { %2151 = vmatmul.msk.bf16.gmra.mxu1 %vm173_vm0, %v2543_v19  ;;  %2155 = vmatmul.msk.bf16.gmra.mxu3 %vm173_vm0, %v2547_v11  ;;  %v2310_v11 = vld [vmem:[%s3450_s2 + $0x1c0] sm:$0xff] }
  0x19   :  { %2143 = vmatmul.msk.bf16.gmra.mxu0 %vm173_vm0, %v2543_v19  ;;  %2148 = vmatmul.msk.bf16.gmra.mxu2 %vm173_vm0, %v2548_v20  ;;  %v2307_v19 = vld [vmem:[%s3450_s2 + $0x1a8] sm:$0xff] }
  0x1a   :  { %75 = vperm.xlu1 %2610, %v41_v21  }
  0x1b   :  { %90 = vperm.xlu0 %2609, %v44_v22   ;;  %80 = vperm.xlu2 %2611, %v42_v23  }
  0x22   :  { %70 = vperm.xlu1 %2610, %v40_v24   ;;  %v2305_v24 = vld [vmem:[%s3450_s2 + $0x198] sm:$0xff] }
  0x23   :  { %65 = vperm.xlu0 %2609, %v39_v25   ;;  %55 = vperm.xlu2 %2611, %v37_v26   ;;  %v2304_v25 = vld [vmem:[%s3450_s2 + $0x190] sm:$0xff]  ;;  %v2302_v26 = vld [vmem:[%s3450_s2 + $0x180] sm:$0xff] }
  0x28   :  { %2152 = vmatmul.msk.bf16.gmra.mxu1 %vm173_vm0, %v2544_v27  ;;  %2156 = vmatmul.msk.bf16.gmra.mxu3 %vm173_vm0, %v2548_v20 }
  0x29   :  { %2144 = vmatmul.msk.bf16.gmra.mxu0 %vm173_vm0, %v2544_v27  ;;  %2149 = vmatmul.msk.bf16.gmra.mxu2 %vm173_vm0, %v2549_v28 }
  0x2a   :  { %450 = vperm.xlu1 %2610, %v2188_v29  }
  0x2b   :  { %60 = vperm.xlu0 %2609, %v38_v30   ;;  %455 = vperm.xlu2 %2611, %v2189_v31  }
  0x32   :  { %445 = vperm.xlu1 %2610, %v2187_v32  }
  0x33   :  { %440 = vperm.xlu0 %2609, %v2186_v33   ;;  %430 = vperm.xlu2 %2611, %v2184_v34   ;;  %v2380_v33 = vld [vmem:[%s3450_s2 + $0x270] sm:$0xff]  ;;  %v2303_v34 = vld [vmem:[%s3450_s2 + $0x188] sm:$0xff] }
  0x38   :  { %2153 = vmatmul.msk.bf16.gmra.mxu1 %vm173_vm0, %v2545_v35  ;;  %2157 = vmatmul.msk.bf16.gmra.mxu3 %vm173_vm0, %v2549_v28 }
  0x39   :  { %2145 = vmatmul.msk.bf16.gmra.mxu0 %vm173_vm0, %v2545_v35  ;;  %v2381_v35 = vld [vmem:[%s3450_s2 + $0x278] sm:$0xff] }
  0x3a   :  { %420 = vperm.xlu1 %2610, %v2182_v36  }
  0x3b   :  { %435 = vperm.xlu0 %2609, %v2185_v37   ;;  %425 = vperm.xlu2 %2611, %v2183_v38  }
  0x42   :  { %415 = vperm.xlu1 %2610, %v2181_v39  }
  0x43   :  { %410 = vperm.xlu0 %2609, %v2180_v40   ;;  %400 = vperm.xlu2 %2611, %v2178_v41   ;;  %v2379_v41 = vld [vmem:[%s3450_s2 + $0x268] sm:$0xff] }
  0x49   :  { %2146 = vmatmul.msk.bf16.gmra.mxu0 %vm173_vm0, %v2663_v12  ;;  %v2308_v12 = vld [vmem:[%s3450_s2 + $0x1b0] sm:$0xff] }
  0x4a   :  { %390 = vperm.xlu1 %2610, %v2176_v42  }
  0x4b   :  { %405 = vperm.xlu0 %2609, %v2179_v43   ;;  %395 = vperm.xlu2 %2611, %v2177_v44   ;;  %v2378_v44 = vld [vmem:[%s3450_s2 + $0x260] sm:$0xff] }
  0x52   :  { %385 = vperm.xlu1 %2610, %v2175_v45   ;;  %v2376_v45 = vld [vmem:[%s3450_s2 + $0x250] sm:$0xff] }
  0x53   :  { %380 = vperm.xlu0 %2609, %v2174_v46   ;;  %758 = vperm.xlu2 %2611, %v2252_v47  }
  0x5a   :  { %748 = vperm.xlu1 %2610, %v2250_v48  }
  0x5b   :  { %763 = vperm.xlu0 %2609, %v2253_v49   ;;  %753 = vperm.xlu2 %2611, %v2251_v50  }
  0x5d   :  { %v2917_v38 = vpop.permute.xlu2 %105 }
  0x62   :  { %743 = vperm.xlu1 %2610, %v2249_v51  }
  0x63   :  { %738 = vperm.xlu0 %2609, %v2248_v52   ;;  %728 = vperm.xlu2 %2611, %v2246_v53  }
  0x6a   :  { %718 = vperm.xlu1 %2610, %v2244_v54  }
  0x6b   :  { %733 = vperm.xlu0 %2609, %v2247_v55   ;;  %723 = vperm.xlu2 %2611, %v2245_v56  }
  0x72   :  { %713 = vperm.xlu1 %2610, %v2243_v57   ;;  %v111_v57 = vpop.permute.xlu2 %110 }
  0x73   :  { %708 = vperm.xlu0 %2609, %v2242_v58   ;;  %698 = vperm.xlu2 %2611, %v2240_v59   ;;  %v2374_v58 = vld [vmem:[%s3450_s2 + $0x240] sm:$0xff] }
  0x74   :  { %v2906_v32 = vpop.permute.xlu1 %115 }
  0x75   :  { %v126_v29 = vpop.permute.xlu0 %125 }
  0x7a   :  { %688 = vperm.xlu1 %2610, %v2238_v60  }
  0x7b   :  { %703 = vperm.xlu0 %2609, %v2241_v61   ;;  %693 = vperm.xlu2 %2611, %v2239_v62   ;;  %v2377_v62 = vld [vmem:[%s3450_s2 + $0x258] sm:$0xff] }
  0x7c   :  { %v121_v46 = vpop.permute.xlu1 %120 }
  0x7d   :  { %v131_v40 = vpop.permute.xlu0 %130 }
  0x82   :  { %1071 = vperm.xlu1 %2610, %v2317_v63   ;;  %v2375_v63 = vld [vmem:[%s3450_s2 + $0x248] sm:$0xff] }
  0x83   :  { %1066 = vperm.xlu0 %2609, %v2316_v0   ;;  %1056 = vperm.xlu2 %2611, %v2314_v1  }
  0x85   :  { %v2847_v4 = vpop.f32.mrf.mxu1  ;;  %v96_v0 = vpop.permute.xlu0 %95 }
  0x86   :  { %v2842_v2 = vpop.f32.mrf.mxu0 }
  0x8a   :  { %1046 = vperm.xlu1 %2610, %v2312_v3  }
  0x8b   :  { %1061 = vperm.xlu0 %2609, %v2315_v5   ;;  %1051 = vperm.xlu2 %2611, %v2313_v6   ;;  %v2857_v8 = vpop.f32.mrf.mxu3 }
  0x8c   :  { %v2855_v7 = vpop.f32.mrf.mxu2 }
  0x8d   :  { %v2870_v13 = vpop.f32.mrf.mxu1  ;;  %v233_v59 = vadd.f32 %v2855_v7, %v2917_v38 }
  0x8e   :  { %v2859_v9 = vpop.f32.mrf.mxu0 }
  0x8f   :  { %v316_v5 = vmax.f32 %v233_v59, 0.0 }
  0x92   :  { %1041 = vperm.xlu1 %2610, %v2311_v10  }
  0x93   :  { %1036 = vperm.xlu0 %2609, %v2310_v11   ;;  %1026 = vperm.xlu2 %2611, %v2308_v12   ;;  %v2872_v15 = vpop.f32.mrf.mxu3  ;;  %v2373_v11 = vld [vmem:[%s3450_s2 + $0x238] sm:$0xff] }
  0x94   :  { %v234_v14 = vpop.f32.mrf.mxu2 }
  0x95   :  { %v2885_v21 = vpop.f32.mrf.mxu1  ;;  %v235_v60 = vadd.f32 %v234_v14, %v111_v57  ;;  %v2372_v14 = vld [vmem:[%s3450_s2 + $0x230] sm:$0xff] }
  0x96   :  { %v2874_v16 = vpop.f32.mrf.mxu0 }
  0x97   :  { %v318_v6 = vmax.f32 %v235_v60, 0.0  ;;  %v2366_v60 = vld [vmem:[%s3450_s2 + $0x200] sm:$0xff] }
  0x99   :  { %v355_v12 = vpack.c.bf16 %v318_v6, %v316_v5 }
  0x9a   :  { %1016 = vperm.xlu1 %2610, %v2306_v17   ;;  %v2370_v17 = vld [vmem:[%s3450_s2 + $0x220] sm:$0xff] }
  0x9b   :  { %1031 = vperm.xlu0 %2609, %v2309_v18   ;;  %1021 = vperm.xlu2 %2611, %v2307_v19   ;;  %v2887_v22 = vpop.f32.mrf.mxu3  ;;  %v101_v18 = vpop.permute.xlu1 %100 }
  0x9c   :  { %v237_v20 = vpop.f32.mrf.mxu2  ;;  %v91_v19 = vpop.permute.xlu0 %90 }
  0x9d   :  { %v2902_v30 = vpop.f32.mrf.mxu1  ;;  %v238_v47 = vadd.f32 %v237_v20, %v2906_v32 }
  0x9e   :  { %v2889_v23 = vpop.f32.mrf.mxu0 }
  0x9f   :  { %v320_v53 = vmax.f32 %v238_v47, 0.0 }
  0xa2   :  { %1011 = vperm.xlu1 %2610, %v2305_v24  }
  0xa3   :  { %1006 = vperm.xlu0 %2609, %v2304_v25   ;;  %996 = vperm.xlu2 %2611, %v2302_v26   ;;  %v2900_v28 = vpop.f32.mrf.mxu3 }
  0xa4   :  { %v239_v27 = vpop.f32.mrf.mxu2 }
  0xa5   :  { %v2924_v42 = vpop.f32.mrf.mxu1  ;;  %v240_v48 = vadd.f32 %v239_v27, %v121_v46 }
  0xa6   :  { %v2904_v31 = vpop.f32.mrf.mxu0 }
  0xa7   :  { %v322_v54 = vmax.f32 %v240_v48, 0.0 }
  0xa9   :  { %v357_v3 = vpack.c.bf16 %v322_v54, %v320_v53 }
  0xaa   :  { %1374 = vperm.xlu1 %2610, %v2380_v33  }
  0xab   :  { %1001 = vperm.xlu0 %2609, %v2303_v34   ;;  %1379 = vperm.xlu2 %2611, %v2381_v35   ;;  %v286_v37 = vpop.f32.mrf.mxu3  ;;  %v86_v34 = vpop.permute.xlu2 %85 }
  0xac   :  { %v242_v36 = vpop.f32.mrf.mxu2  ;;  %v287_v35 = vadd.f32 %v286_v37, %v2906_v32  ;;  %v282_v32 = vadd.f32 %v2887_v22, %v2917_v38  ;;  %v2367_v38 = vld [vmem:[%s3450_s2 + $0x208] sm:$0xff] }
  0xad   :  { %v243_v43 = vadd.f32 %v242_v36, %v126_v29  ;;  %v2944_v1 = vpop.f32.mrf.mxu1 }
  0xae   :  { %v2919_v39 = vpop.f32.mrf.mxu0  ;;  %v321_v37 = vmax.f32 %v287_v35, 0.0  ;;  %v317_v53 = vmax.f32 %v282_v32, 0.0 }
  0xaf   :  { %v324_v50 = vmax.f32 %v243_v43, 0.0  ;;  %v2368_v43 = vld [vmem:[%s3450_s2 + $0x210] sm:$0xff] }
  0xb2   :  { %1369 = vperm.xlu1 %2610, %v2379_v41  }
  0xb3   :  { %1364 = vperm.xlu0 %2609, %v2378_v44   ;;  %1354 = vperm.xlu2 %2611, %v2376_v45   ;;  %v288_v52 = vpop.f32.mrf.mxu3  ;;  %v284_v44 = vadd.f32 %v2900_v28, %v111_v57  ;;  %v279_v28 = vadd.f32 %v2872_v15, %v101_v18 }
  0xb4   :  { %v244_v49 = vpop.f32.mrf.mxu2  ;;  %v289_v26 = vadd.f32 %v288_v52, %v121_v46  ;;  %v76_v46 = vpop.permute.xlu1 %75  ;;  %v277_v52 = vadd.f32 %v2857_v8, %v96_v0 }
  0xb5   :  { %v245_v51 = vadd.f32 %v244_v49, %v131_v40  ;;  %v271_v24 = vpop.f32.mrf.mxu1  ;;  %v319_v48 = vmax.f32 %v284_v44, 0.0  ;;  %v66_v49 = vpop.permute.xlu0 %65  ;;  %v315_v59 = vmax.f32 %v279_v28, 0.0  ;;  %v218_v5 = vadd.f32 %v2904_v31, %v76_v46 }
  0xb6   :  { %v222_v56 = vpop.f32.mrf.mxu0  ;;  %v323_v45 = vmax.f32 %v289_v26, 0.0  ;;  %v213_v31 = vadd.f32 %v2874_v16, %v66_v49 }
  0xb7   :  { %v326_v55 = vmax.f32 %v245_v51, 0.0  ;;  %v223_v57 = vadd.f32 %v222_v56, %v86_v34  ;;  %v356_v15 = vpack.c.bf16 %v319_v48, %v317_v53  ;;  %v2444_v56 = vld [vmem:[%s3450_s2 + $0x2f0] sm:$0xff] }
  0xb8   :  { %v358_v51 = vpack.c.bf16 %v323_v45, %v321_v37 }
  0xb9   :  { %v359_v61 = vpack.c.bf16 %v326_v55, %v324_v50 }
  0xba   :  { %1344 = vperm.xlu1 %2610, %v2374_v58  }
  0xbb   :  { %506 = vmatpush.bf16.msrb.mxu2 %v359_v61  ;;  %1359 = vperm.xlu0 %2609, %v2377_v62   ;;  %v291_v7 = vpop.f32.mrf.mxu3  ;;  %v81_v61 = vpop.permute.xlu2 %80  ;;  %v272_v62 = vadd.f32 %v271_v24, %v86_v34 }
  0xbc   :  { %1349 = vperm.xlu2 %2611, %v2375_v63   ;;  %v292_v20 = vadd.f32 %v291_v7, %v126_v29  ;;  %v2371_v29 = vld [vmem:[%s3450_s2 + $0x228] sm:$0xff]  ;;  %v220_v6 = vadd.f32 %v2919_v39, %v81_v61  ;;  %v308_v7 = vmax.f32 %v223_v57, 0.0  ;;  %v304_v39 = vmax.f32 %v218_v5, 0.0  ;;  %v2437_v57 = vld [vmem:[%s3450_s2 + $0x2b8] sm:$0xff]  ;;  %v2556_v5 = vld [vmem:[%s3452_s1 + $0x70] sm:$0xff] }
  0xbd   :  { %v273_v54 = vpop.f32.mrf.mxu1 }
  0xbe   :  { %v224_v10 = vpop.f32.mrf.mxu0  ;;  %v325_v36 = vmax.f32 %v292_v20, 0.0  ;;  %v274_v8 = vadd.f32 %v273_v54, %v91_v19  ;;  %v71_v20 = vpop.permute.xlu1 %70  ;;  %v2436_v54 = vld [vmem:[%s3450_s2 + $0x2b0] sm:$0xff] }
  0xbf   :  { %507 = vmatpush.bf16.msrb.mxu2 %v357_v3  ;;  %v225_v58 = vadd.f32 %v224_v10, %v91_v19  ;;  %v313_v3 = vmax.f32 %v277_v52, 0.0  ;;  %v215_v24 = vadd.f32 %v2889_v23, %v71_v20  ;;  %v264_v34 = vadd.f32 %v2902_v30, %v71_v20  ;;  %v2550_v52 = vld [vmem:[%s3452_s1 + $0x40] sm:$0xff] }
  0xc0   :  { %v311_v19 = vmax.f32 %v274_v8, 0.0  ;;  %v2494_v8 = vld [vmem:[%s3450_s2 + $0x300] sm:$0xff] }
  0xc1   :  { %v310_v10 = vmax.f32 %v225_v58, 0.0  ;;  %v302_v44 = vmax.f32 %v215_v24, 0.0  ;;  %v2435_v58 = vld [vmem:[%s3450_s2 + $0x2a8] sm:$0xff] }
  0xc2   :  { %1339 = vperm.xlu1 %2610, %v2373_v11  }
  0xc3   :  { %508 = vmatpush.bf16.msrb.mxu2 %v355_v12  ;;  %1334 = vperm.xlu0 %2609, %v2372_v14   ;;  %v293_v25 = vpop.f32.mrf.mxu3  ;;  %v354_v12 = vpack.c.bf16 %v315_v59, %v313_v3  ;;  %v267_v14 = vadd.f32 %v2924_v42, %v76_v46  ;;  %v351_v26 = vpack.c.bf16 %v310_v10, %v308_v7  ;;  %v2551_v59 = vld [vmem:[%s3452_s1 + $0x48] sm:$0xff] }
  0xc4   :  { %1324 = vperm.xlu2 %2611, %v2370_v17   ;;  %v294_v27 = vadd.f32 %v293_v25, %v131_v40  ;;  %v2369_v40 = vld [vmem:[%s3450_s2 + $0x218] sm:$0xff]  ;;  %v269_v17 = vadd.f32 %v2944_v1, %v81_v61  ;;  %v306_v25 = vmax.f32 %v220_v6, 0.0  ;;  %v262_v42 = vadd.f32 %v2885_v21, %v66_v49  ;;  %v2431_v61 = vld [vmem:[%s3450_s2 + $0x288] sm:$0xff] }
  0xc5   :  { %v2445_v1 = vld [vmem:[%s3450_s2 + $0x2f8] sm:$0xff]  ;;  %v305_v16 = vmax.f32 %v267_v14, 0.0  ;;  %v2555_v3 = vld [vmem:[%s3452_s1 + $0x68] sm:$0xff] }
  0xc6   :  { %v227_v33 = vpop.f32.mrf.mxu0  ;;  %v327_v41 = vmax.f32 %v294_v27, 0.0  ;;  %v2442_v27 = vld [vmem:[%s3450_s2 + $0x2e0] sm:$0xff]  ;;  %v307_v35 = vmax.f32 %v269_v17, 0.0  ;;  %v301_v30 = vmax.f32 %v262_v42, 0.0  ;;  %v2557_v6 = vld [vmem:[%s3452_s1 + $0x78] sm:$0xff] }
  0xc7   :  { %v228_v50 = vadd.f32 %v227_v33, %v96_v0  ;;  %v61_v33 = vpop.permute.xlu0 %60 }
  0xc8   :  { %v360_v47 = vpack.c.bf16 %v327_v41, %v325_v36  ;;  %v2443_v36 = vld [vmem:[%s3450_s2 + $0x2e8] sm:$0xff]  ;;  %v56_v41 = vpop.permute.xlu2 %55  ;;  %v210_v21 = vadd.f32 %v2859_v9, %v61_v33  ;;  %v350_v32 = vpack.c.bf16 %v307_v35, %v305_v16  ;;  %v2441_v9 = vld [vmem:[%s3450_s2 + $0x2d8] sm:$0xff] }
  0xc9   :  { %v312_v63 = vmax.f32 %v228_v50, 0.0  ;;  %v208_v45 = vadd.f32 %v2842_v2, %v56_v41  ;;  %v257_v37 = vadd.f32 %v2847_v4, %v56_v41  ;;  %v2440_v2 = vld [vmem:[%s3450_s2 + $0x2d0] sm:$0xff]  ;;  %v2438_v50 = vld [vmem:[%s3450_s2 + $0x2c0] sm:$0xff] }
  0xca   :  { %1314 = vperm.xlu1 %2610, %v2368_v43   ;;  %555 = vmatpush.bf16.msrb.mxu3 %v360_v47  ;;  %v300_v43 = vmax.f32 %v213_v31, 0.0  ;;  %v259_v47 = vadd.f32 %v2870_v13, %v61_v33  ;;  %v298_v46 = vmax.f32 %v210_v21, 0.0 }
  0xcb   :  { %1329 = vperm.xlu0 %2609, %v2371_v29   ;;  %v349_v29 = vpack.c.bf16 %v306_v25, %v304_v39  ;;  %v296_v48 = vmax.f32 %v208_v45, 0.0  ;;  %v297_v4 = vmax.f32 %v257_v37, 0.0 }
  0xcc   :  { %1319 = vperm.xlu2 %2611, %v2369_v40   ;;  %v303_v40 = vmax.f32 %v264_v34, 0.0  ;;  %v347_v28 = vpack.c.bf16 %v302_v44, %v300_v43  ;;  %v299_v49 = vmax.f32 %v259_v47, 0.0  ;;  %v451_v43 = vpop.permute.xlu1 %450 }
  0xce   :  { %v229_v55 = vpop.f32.mrf.mxu0  ;;  %556 = vmatpush.bf16.msrb.mxu3 %v358_v51  ;;  %v348_v13 = vpack.c.bf16 %v303_v40, %v301_v30  ;;  %v345_v51 = vpack.c.bf16 %v298_v46, %v296_v48  ;;  %v346_v53 = vpack.c.bf16 %v299_v49, %v297_v4 }
  0xcf   :  { %v230_v22 = vadd.f32 %v229_v55, %v101_v18  ;;  %v309_v18 = vmax.f32 %v272_v62, 0.0  ;;  %v2439_v55 = vld [vmem:[%s3450_s2 + $0x2c8] sm:$0xff]  ;;  %v441_v47 = vpop.permute.xlu0 %440 }
  0xd0   :  { %v2495_v62 = vld [vmem:[%s3450_s2 + $0x308] sm:$0xff] }
  0xd1   :  { %v314_v0 = vmax.f32 %v230_v22, 0.0  ;;  %v352_v23 = vpack.c.bf16 %v311_v19, %v309_v18  ;;  %v2434_v22 = vld [vmem:[%s3450_s2 + $0x2a0] sm:$0xff] }
  0xd2   :  { %1309 = vperm.xlu1 %2610, %v2367_v38   ;;  %557 = vmatpush.bf16.msrb.mxu3 %v356_v15  ;;  %v2432_v38 = vld [vmem:[%s3450_s2 + $0x290] sm:$0xff]  ;;  %v2430_v15 = vld [vmem:[%s3450_s2 + $0x280] sm:$0xff] }
  0xd3   :  { %1304 = vperm.xlu0 %2609, %v2366_v60   ;;  %v353_v11 = vpack.c.bf16 %v314_v0, %v312_v63  ;;  %v2433_v60 = vld [vmem:[%s3450_s2 + $0x298] sm:$0xff]  ;;  %v2552_v63 = vld [vmem:[%s3452_s1 + $0x50] sm:$0xff] }
  0xd4   :  { %1682 = vperm.xlu2 %2611, %v2444_v56   ;;  %v2553_v0 = vld [vmem:[%s3452_s1 + $0x58] sm:$0xff]  ;;  %v2554_v56 = vld [vmem:[%s3452_s1 + $0x60] sm:$0xff]  ;;  %v446_v45 = vpop.permute.xlu1 %445 }
  0xd5   :  { %509 = vmatpush.bf16.msrb.mxu2 %v353_v11 }
  0xd6   :  { %558 = vmatpush.bf16.msrb.mxu3 %v354_v12 }
  0xd9   :  { %510 = vmatpush.bf16.msrb.mxu2 %v351_v26 }
  0xda   :  { %1672 = vperm.xlu1 %2610, %v2442_v27   ;;  %559 = vmatpush.bf16.msrb.mxu3 %v352_v23 }
  0xdb   :  { %1687 = vperm.xlu0 %2609, %v2445_v1  }
  0xdc   :  { %1677 = vperm.xlu2 %2611, %v2443_v36   ;;  %v421_v46 = vpop.permute.xlu1 %420 }
  0xdd   :  { %511 = vmatpush.bf16.msrb.mxu2 %v349_v29  ;;  %v456_v29 = vpop.permute.xlu2 %455 }
  0xde   :  { %560 = vmatpush.bf16.msrb.mxu3 %v350_v32 }
  0xe1   :  { %512 = vmatpush.bf16.msrb.mxu2 %v347_v28 }
  0xe2   :  { %1667 = vperm.xlu1 %2610, %v2441_v9   ;;  %561 = vmatpush.bf16.msrb.mxu3 %v348_v13  ;;  %v436_v9 = vpop.permute.xlu0 %435 }
  0xe3   :  { %1662 = vperm.xlu0 %2609, %v2440_v2  }
  0xe4   :  { %1652 = vperm.xlu2 %2611, %v2438_v50  }
  0xe5   :  { %513 = vmatpush.bf16.msrb.mxu2 %v345_v51  ;;  %v431_v32 = vpop.permute.xlu2 %430 }
  0xe6   :  { %562 = vmatpush.bf16.msrb.mxu3 %v346_v53  ;;  %v416_v53 = vpop.permute.xlu1 %415 }
  0xe8   :  { %514 = vmatmul.bf16.vlgmr.msrb.gmra.mxu2 %v2550_v52 }
  0xe9   :  { %563 = vmatmul.bf16.vlgmr.msrb.gmra.mxu3 %v2550_v52 }
  0xea   :  { %1642 = vperm.xlu1 %2610, %v2436_v54  }
  0xeb   :  { %1657 = vperm.xlu0 %2609, %v2439_v55  }
  0xec   :  { %1647 = vperm.xlu2 %2611, %v2437_v57  }
  0xed   :  { %v426_v2 = vpop.permute.xlu2 %425 }
  0xf2   :  { %1637 = vperm.xlu1 %2610, %v2435_v58  }
  0xf3   :  { %1632 = vperm.xlu0 %2609, %v2434_v22  }
  0xf4   :  { %1622 = vperm.xlu2 %2611, %v2432_v38  }
  0xf8   :  { %519 = vmatmul.bf16.gmra.mxu2 %v2551_v59 }
  0xf9   :  { %568 = vmatmul.bf16.gmra.mxu3 %v2551_v59  ;;  %v411_v59 = vpop.permute.xlu0 %410 }
  0xfa   :  { %1612 = vperm.xlu1 %2610, %v2430_v15  }
  0xfb   :  { %1627 = vperm.xlu0 %2609, %v2433_v60  }
  0xfc   :  { %1617 = vperm.xlu2 %2611, %v2431_v61  }
 0x102   :  { %1925 = vperm.xlu1 %2610, %v2495_v62  }
 0x103   :  { %1920 = vperm.xlu0 %2609, %v2494_v8  }
 0x108   :  { %524 = vmatmul.bf16.gmra.mxu2 %v2552_v63 }
 0x109   :  { %573 = vmatmul.bf16.gmra.mxu3 %v2552_v63 }
 0x118   :  { %529 = vmatmul.bf16.gmra.mxu2 %v2553_v0 }
 0x119   :  { %578 = vmatmul.bf16.gmra.mxu3 %v2553_v0 }
 0x128   :  { %534 = vmatmul.bf16.gmra.mxu2 %v2554_v56 }
 0x129   :  { %583 = vmatmul.bf16.gmra.mxu3 %v2554_v56 }
 0x138   :  { %539 = vmatmul.bf16.gmra.mxu2 %v2555_v3 }
 0x139   :  { %588 = vmatmul.bf16.gmra.mxu3 %v2555_v3 }
 0x148   :  { %544 = vmatmul.bf16.gmra.mxu2 %v2556_v5 }
 0x149   :  { %593 = vmatmul.bf16.gmra.mxu3 %v2556_v5 }
 0x158   :  { %549 = vmatmul.bf16.gmra.mxu2 %v2557_v6 }
 0x159   :  { %598 = vmatmul.bf16.gmra.mxu3 %v2557_v6  ;;  %v401_v6 = vpop.permute.xlu2 %400 }
 0x16b   :  { %v3066_v7 = vpop.f32.mrf.mxu2 }
 0x16c   :  { %v3068_v10 = vpop.f32.mrf.mxu3 }
 0x173   :  { %v3070_v11 = vpop.f32.mrf.mxu2 }
 0x174   :  { %v3072_v12 = vpop.f32.mrf.mxu3 }
 0x17b   :  { %v3074_v14 = vpop.f32.mrf.mxu2 }
 0x17c   :  { %v3076_v17 = vpop.f32.mrf.mxu3 }
 0x183   :  { %v3078_v18 = vpop.f32.mrf.mxu2 }
 0x184   :  { %v3080_v19 = vpop.f32.mrf.mxu3 }
 0x18b   :  { %v3082_v20 = vpop.f32.mrf.mxu2 }
 0x18c   :  { %v3084_v31 = vpop.f32.mrf.mxu3 }
 0x193   :  { %v3086_v24 = vpop.f32.mrf.mxu2 }
 0x194   :  { %v3088_v39 = vpop.f32.mrf.mxu3 }
 0x19b   :  { %v3090_v25 = vpop.f32.mrf.mxu2 }
 0x19c   :  { %v3092_v26 = vpop.f32.mrf.mxu3 }
 0x1a3   :  { %v532_v27 = vpop.f32.mrf.mxu2 }
 0x1a4   :  { %v3094_v42 = vpop.f32.mrf.mxu3 }
 0x1ab   :  { %v535_v33 = vpop.f32.mrf.mxu2 }
 0x1ac   :  { %v584_v1 = vpop.f32.mrf.mxu3 }
 0x1b3   :  { %v537_v34 = vpop.f32.mrf.mxu2 }
 0x1b4   :  { %v586_v16 = vpop.f32.mrf.mxu3  ;;  %v538_v5 = vadd.f32 %v537_v34, %v426_v2  ;;  %v531_v34 = vadd.f32 %v3090_v25, %v411_v59 }
 0x1bb   :  { %v540_v35 = vpop.f32.mrf.mxu2 }
 0x1bc   :  { %v589_v23 = vpop.f32.mrf.mxu3  ;;  %v541_v8 = vadd.f32 %v540_v35, %v431_v32  ;;  %v391_v35 = vpop.permute.xlu1 %390 }
 0x1c3   :  { %v542_v36 = vpop.f32.mrf.mxu2 }
 0x1c4   :  { %v591_v41 = vpop.f32.mrf.mxu3  ;;  %v543_v22 = vadd.f32 %v542_v36, %v436_v9  ;;  %v536_v36 = vadd.f32 %v535_v33, %v421_v46 }
 0x1c5   :  { %v592_v63 = vadd.f32 %v591_v41, %v436_v9  ;;  %v585_v41 = vadd.f32 %v584_v1, %v421_v46  ;;  %v526_v46 = vadd.f32 %v3082_v20, %v401_v6 }
 0x1cb   :  { %v545_v21 = vpop.f32.mrf.mxu2 }
 0x1cc   :  { %v594_v44 = vpop.f32.mrf.mxu3  ;;  %v546_v51 = vadd.f32 %v545_v21, %v441_v47  ;;  %v626_v21 = vmax.f32 %v543_v22, 0.0  ;;  %v612_v22 = vmax.f32 %v526_v46, 0.0 }
 0x1cd   :  { %v595_v38 = vadd.f32 %v594_v44, %v441_v47  ;;  %v587_v44 = vadd.f32 %v586_v16, %v426_v2  ;;  %v627_v47 = vmax.f32 %v592_v63, 0.0  ;;  %v580_v2 = vadd.f32 %v3092_v26, %v411_v59 }
 0x1ce   :  { %v628_v0 = vmax.f32 %v546_v51, 0.0  ;;  %v616_v51 = vmax.f32 %v531_v34, 0.0 }
 0x1d3   :  { %v547_v30 = vpop.f32.mrf.mxu2 }
 0x1d4   :  { %v596_v40 = vpop.f32.mrf.mxu3  ;;  %v548_v13 = vadd.f32 %v547_v30, %v446_v45  ;;  %v624_v30 = vmax.f32 %v541_v8, 0.0 }
 0x1d5   :  { %v597_v54 = vadd.f32 %v596_v40, %v446_v45  ;;  %v629_v45 = vmax.f32 %v595_v38, 0.0 }
 0x1d6   :  { %v630_v15 = vmax.f32 %v548_v13, 0.0  ;;  %v623_v13 = vmax.f32 %v587_v44, 0.0  ;;  %v2563_v44 = vld [vmem:[%s3452_s1 + $0xa8] sm:$0xff] }
 0x1d7   :  { %v631_v56 = vmax.f32 %v597_v54, 0.0  ;;  %v575_v54 = vadd.f32 %v3084_v31, %v401_v6 }
 0x1d9   :  { %v666_v40 = vpack.c.bf16 %v631_v56, %v629_v45  ;;  %v613_v31 = vmax.f32 %v575_v54, 0.0  ;;  %v2560_v45 = vld [vmem:[%s3452_s1 + $0x90] sm:$0xff] }
 0x1db   :  { %v550_v37 = vpop.f32.mrf.mxu2 }
 0x1dc   :  { %v599_v28 = vpop.f32.mrf.mxu3  ;;  %v551_v48 = vadd.f32 %v550_v37, %v451_v43  ;;  %v533_v37 = vadd.f32 %v532_v27, %v416_v53 }
 0x1dd   :  { %v600_v50 = vadd.f32 %v599_v28, %v451_v43  ;;  %v590_v43 = vadd.f32 %v589_v23, %v431_v32  ;;  %v622_v28 = vmax.f32 %v538_v5, 0.0  ;;  %v406_v23 = vpop.permute.xlu0 %405  ;;  %v582_v32 = vadd.f32 %v3094_v42, %v416_v53 }
 0x1de   :  { %v632_v55 = vmax.f32 %v551_v48, 0.0  ;;  %v663_v48 = vpack.c.bf16 %v626_v21, %v624_v30  ;;  %v528_v16 = vadd.f32 %v3086_v24, %v406_v23  ;;  %v618_v27 = vmax.f32 %v533_v37, 0.0  ;;  %v2564_v30 = vld [vmem:[%s3452_s1 + $0xb0] sm:$0xff] }
 0x1df   :  { %v633_v60 = vmax.f32 %v600_v50, 0.0  ;;  %v625_v9 = vmax.f32 %v590_v43, 0.0  ;;  %v621_v50 = vmax.f32 %v585_v41, 0.0  ;;  %v577_v25 = vadd.f32 %v3088_v39, %v406_v23 }
 0x1e0   :  { %v614_v24 = vmax.f32 %v528_v16, 0.0  ;;  %v659_v26 = vpack.c.bf16 %v618_v27, %v616_v51 }
 0x1e1   :  { %v664_v33 = vpack.c.bf16 %v627_v47, %v625_v9  ;;  %v662_v42 = vpack.c.bf16 %v623_v13, %v621_v50  ;;  %v615_v38 = vmax.f32 %v577_v25, 0.0  ;;  %v2565_v47 = vld [vmem:[%s3452_s1 + $0xb8] sm:$0xff] }
 0x1e3   :  { %v552_v49 = vpop.f32.mrf.mxu2 }
 0x1e4   :  { %v553_v4 = vadd.f32 %v552_v49, %v456_v29  ;;  %v601_v52 = vpop.f32.mrf.mxu3  ;;  %v620_v49 = vmax.f32 %v536_v36, 0.0  ;;  %v2562_v36 = vld [vmem:[%s3452_s1 + $0xa0] sm:$0xff] }
 0x1e5   :  { %v602_v58 = vadd.f32 %v601_v52, %v456_v29  ;;  %v665_v29 = vpack.c.bf16 %v630_v15, %v628_v0  ;;  %v619_v52 = vmax.f32 %v582_v32, 0.0  ;;  %v381_v15 = vpop.permute.xlu0 %380 }
 0x1e6   :  { %v634_v57 = vmax.f32 %v553_v4, 0.0  ;;  %v661_v1 = vpack.c.bf16 %v622_v28, %v620_v49  ;;  %v396_v4 = vpop.permute.xlu2 %395  ;;  %v565_v0 = vadd.f32 %v3068_v10, %v381_v15  ;;  %v2559_v10 = vld [vmem:[%s3452_s1 + $0x88] sm:$0xff] }
 0x1e7   :  { %v635_v61 = vmax.f32 %v602_v58, 0.0  ;;  %v523_v53 = vadd.f32 %v3078_v18, %v396_v4  ;;  %v386_v58 = vpop.permute.xlu1 %385  ;;  %v572_v20 = vadd.f32 %v3080_v19, %v396_v4  ;;  %v570_v18 = vadd.f32 %v3076_v17, %v391_v35 }
 0x1e8   :  { %v667_v62 = vpack.c.bf16 %v634_v57, %v632_v55  ;;  %v617_v55 = vmax.f32 %v580_v2, 0.0  ;;  %v521_v57 = vadd.f32 %v3074_v14, %v391_v35  ;;  %v518_v59 = vadd.f32 %v3070_v11, %v386_v58 }
 0x1e9   :  { %v668_v3 = vpack.c.bf16 %v635_v61, %v633_v60  ;;  %v610_v60 = vmax.f32 %v523_v53, 0.0  ;;  %v657_v61 = vpack.c.bf16 %v614_v24, %v612_v22  ;;  %v567_v14 = vadd.f32 %v3072_v12, %v386_v58 }
 0x1ea   :  { %814 = vmatpush.bf16.msrb.mxu0 %v667_v62  ;;  %v660_v39 = vpack.c.bf16 %v619_v52, %v617_v55  ;;  %v516_v62 = vadd.f32 %v3066_v7, %v381_v15  ;;  %v608_v8 = vmax.f32 %v521_v57, 0.0  ;;  %v611_v63 = vmax.f32 %v572_v20, 0.0  ;;  %v2558_v7 = vld [vmem:[%s3452_s1 + $0x80] sm:$0xff] }
 0x1eb   :  { %863 = vmatpush.bf16.msrb.mxu1 %v668_v3  ;;  %v658_v19 = vpack.c.bf16 %v615_v38, %v613_v31  ;;  %v606_v56 = vmax.f32 %v518_v59, 0.0  ;;  %v609_v3 = vmax.f32 %v570_v18, 0.0  ;;  %v607_v17 = vmax.f32 %v567_v14, 0.0 }
 0x1ec   :  { %v655_v11 = vpack.c.bf16 %v610_v60, %v608_v8  ;;  %v604_v5 = vmax.f32 %v516_v62, 0.0  ;;  %v605_v43 = vmax.f32 %v565_v0, 0.0 }
 0x1ed   :  { %v656_v6 = vpack.c.bf16 %v611_v63, %v609_v3  ;;  %v764_v55 = vpop.permute.xlu0 %763 }
 0x1ee   :  { %815 = vmatpush.bf16.msrb.mxu0 %v665_v29  ;;  %v653_v21 = vpack.c.bf16 %v606_v56, %v604_v5  ;;  %v654_v12 = vpack.c.bf16 %v607_v17, %v605_v43  ;;  %v2561_v29 = vld [vmem:[%s3452_s1 + $0x98] sm:$0xff]  ;;  %v759_v53 = vpop.permute.xlu2 %758 }
 0x1ef   :  { %864 = vmatpush.bf16.msrb.mxu1 %v666_v40  ;;  %v749_v58 = vpop.permute.xlu1 %748 }
 0x1f2   :  { %816 = vmatpush.bf16.msrb.mxu0 %v663_v48 }
 0x1f3   :  { %865 = vmatpush.bf16.msrb.mxu1 %v664_v33 }
 0x1f5   :  { %v739_v22 = vpop.permute.xlu0 %738 }
 0x1f6   :  { %817 = vmatpush.bf16.msrb.mxu0 %v661_v1 }
 0x1f7   :  { %866 = vmatpush.bf16.msrb.mxu1 %v662_v42  ;;  %v744_v15 = vpop.permute.xlu1 %743 }
 0x1fa   :  { %818 = vmatpush.bf16.msrb.mxu0 %v659_v26  ;;  %v754_v26 = vpop.permute.xlu2 %753 }
 0x1fb   :  { %867 = vmatpush.bf16.msrb.mxu1 %v660_v39 }
 0x1fd   :  { %v734_v18 = vpop.permute.xlu0 %733 }
 0x1fe   :  { %819 = vmatpush.bf16.msrb.mxu0 %v657_v61 }
 0x1ff   :  { %868 = vmatpush.bf16.msrb.mxu1 %v658_v19 }
 0x202   :  { %820 = vmatpush.bf16.msrb.mxu0 %v655_v11  ;;  %v729_v39 = vpop.permute.xlu2 %728 }
 0x203   :  { %869 = vmatpush.bf16.msrb.mxu1 %v656_v6  ;;  %v719_v6 = vpop.permute.xlu1 %718 }
 0x206   :  { %821 = vmatpush.bf16.msrb.mxu0 %v653_v21 }
 0x207   :  { %870 = vmatpush.bf16.msrb.mxu1 %v654_v12 }
 0x209   :  { %822 = vmatmul.bf16.vlgmr.msrb.gmra.mxu0 %v2558_v7 }
 0x20a   :  { %871 = vmatmul.bf16.vlgmr.msrb.gmra.mxu1 %v2558_v7  ;;  %v724_v19 = vpop.permute.xlu2 %723 }
 0x219   :  { %827 = vmatmul.bf16.gmra.mxu0 %v2559_v10 }
 0x21a   :  { %876 = vmatmul.bf16.gmra.mxu1 %v2559_v10 }
 0x229   :  { %832 = vmatmul.bf16.gmra.mxu0 %v2560_v45 }
 0x22a   :  { %881 = vmatmul.bf16.gmra.mxu1 %v2560_v45 }
 0x239   :  { %837 = vmatmul.bf16.gmra.mxu0 %v2561_v29 }
 0x23a   :  { %886 = vmatmul.bf16.gmra.mxu1 %v2561_v29 }
 0x249   :  { %842 = vmatmul.bf16.gmra.mxu0 %v2562_v36 }
 0x24a   :  { %891 = vmatmul.bf16.gmra.mxu1 %v2562_v36 }
 0x259   :  { %847 = vmatmul.bf16.gmra.mxu0 %v2563_v44 }
 0x25a   :  { %896 = vmatmul.bf16.gmra.mxu1 %v2563_v44 }
 0x269   :  { %852 = vmatmul.bf16.gmra.mxu0 %v2564_v30 }
 0x26a   :  { %901 = vmatmul.bf16.gmra.mxu1 %v2564_v30 }
 0x279   :  { %857 = vmatmul.bf16.gmra.mxu0 %v2565_v47 }
 0x27a   :  { %906 = vmatmul.bf16.gmra.mxu1 %v2565_v47  ;;  %v709_v47 = vpop.permute.xlu0 %708 }
 0x286   :  { %v3135_v40 = vpop.f32.mrf.mxu0 }
 0x287   :  { %v3137_v37 = vpop.f32.mrf.mxu1 }
 0x28e   :  { %v3139_v35 = vpop.f32.mrf.mxu0 }
 0x28f   :  { %v3141_v41 = vpop.f32.mrf.mxu1 }
 0x296   :  { %v3143_v28 = vpop.f32.mrf.mxu0 }
 0x297   :  { %v3145_v9 = vpop.f32.mrf.mxu1 }
 0x29e   :  { %v3147_v48 = vpop.f32.mrf.mxu0 }
 0x29f   :  { %v3149_v34 = vpop.f32.mrf.mxu1 }
 0x2a6   :  { %v3151_v23 = vpop.f32.mrf.mxu0 }
 0x2a7   :  { %v3153_v32 = vpop.f32.mrf.mxu1 }
 0x2ae   :  { %v3155_v49 = vpop.f32.mrf.mxu0 }
 0x2af   :  { %v3157_v13 = vpop.f32.mrf.mxu1 }
 0x2b6   :  { %v3159_v33 = vpop.f32.mrf.mxu0 }
 0x2b7   :  { %v3161_v16 = vpop.f32.mrf.mxu1 }
 0x2be   :  { %v840_v2 = vpop.f32.mrf.mxu0 }
 0x2bf   :  { %v3163_v27 = vpop.f32.mrf.mxu1 }
 0x2c6   :  { %v843_v50 = vpop.f32.mrf.mxu0 }
 0x2c7   :  { %v892_v1 = vpop.f32.mrf.mxu1 }
 0x2ce   :  { %v845_v46 = vpop.f32.mrf.mxu0 }
 0x2cf   :  { %v894_v4 = vpop.f32.mrf.mxu1  ;;  %v846_v30 = vadd.f32 %v845_v46, %v734_v18  ;;  %v839_v46 = vadd.f32 %v3159_v33, %v719_v6 }
 0x2d6   :  { %v848_v25 = vpop.f32.mrf.mxu0 }
 0x2d7   :  { %v897_v51 = vpop.f32.mrf.mxu1  ;;  %v849_v10 = vadd.f32 %v848_v25, %v739_v22  ;;  %v699_v25 = vpop.permute.xlu2 %698 }
 0x2de   :  { %v850_v52 = vpop.f32.mrf.mxu0 }
 0x2df   :  { %v899_v42 = vpop.f32.mrf.mxu1  ;;  %v851_v5 = vadd.f32 %v850_v52, %v744_v15  ;;  %v844_v52 = vadd.f32 %v843_v50, %v729_v39 }
 0x2e0   :  { %v900_v45 = vadd.f32 %v899_v42, %v744_v15  ;;  %v893_v42 = vadd.f32 %v892_v1, %v729_v39  ;;  %v834_v39 = vadd.f32 %v3151_v23, %v709_v47 }
 0x2e6   :  { %v853_v54 = vpop.f32.mrf.mxu0 }
 0x2e7   :  { %v902_v24 = vpop.f32.mrf.mxu1  ;;  %v854_v8 = vadd.f32 %v853_v54, %v749_v58  ;;  %v934_v54 = vmax.f32 %v851_v5, 0.0  ;;  %v920_v5 = vmax.f32 %v834_v39, 0.0 }
 0x2e8   :  { %v903_v17 = vadd.f32 %v902_v24, %v749_v58  ;;  %v895_v24 = vadd.f32 %v894_v4, %v734_v18  ;;  %v935_v58 = vmax.f32 %v900_v45, 0.0  ;;  %v888_v18 = vadd.f32 %v3161_v16, %v719_v6 }
 0x2e9   :  { %v936_v29 = vmax.f32 %v854_v8, 0.0  ;;  %v924_v8 = vmax.f32 %v839_v46, 0.0 }
 0x2ee   :  { %v855_v57 = vpop.f32.mrf.mxu0 }
 0x2ef   :  { %v904_v20 = vpop.f32.mrf.mxu1  ;;  %v856_v61 = vadd.f32 %v855_v57, %v754_v26  ;;  %v932_v57 = vmax.f32 %v849_v10, 0.0 }
 0x2f0   :  { %v905_v0 = vadd.f32 %v904_v20, %v754_v26  ;;  %v937_v26 = vmax.f32 %v903_v17, 0.0 }
 0x2f1   :  { %v938_v43 = vmax.f32 %v856_v61, 0.0  ;;  %v931_v61 = vmax.f32 %v895_v24, 0.0  ;;  %v2571_v24 = vld [vmem:[%s3452_s1 + $0xe8] sm:$0xff] }
 0x2f2   :  { %v939_v36 = vmax.f32 %v905_v0, 0.0  ;;  %v883_v0 = vadd.f32 %v3153_v32, %v709_v47 }
 0x2f4   :  { %v974_v20 = vpack.c.bf16 %v939_v36, %v937_v26  ;;  %v921_v32 = vmax.f32 %v883_v0, 0.0  ;;  %v2568_v26 = vld [vmem:[%s3452_s1 + $0xd0] sm:$0xff] }
 0x2f6   :  { %v858_v38 = vpop.f32.mrf.mxu0 }
 0x2f7   :  { %v907_v59 = vpop.f32.mrf.mxu1  ;;  %v859_v60 = vadd.f32 %v858_v38, %v759_v53  ;;  %v841_v38 = vadd.f32 %v840_v2, %v724_v19 }
 0x2f8   :  { %v908_v62 = vadd.f32 %v907_v59, %v759_v53  ;;  %v898_v53 = vadd.f32 %v897_v51, %v739_v22  ;;  %v930_v59 = vmax.f32 %v846_v30, 0.0  ;;  %v714_v51 = vpop.permute.xlu1 %713  ;;  %v890_v22 = vadd.f32 %v3163_v27, %v724_v19 }
 0x2f9   :  { %v940_v56 = vmax.f32 %v859_v60, 0.0  ;;  %v971_v60 = vpack.c.bf16 %v934_v54, %v932_v57  ;;  %v836_v4 = vadd.f32 %v3155_v49, %v714_v51  ;;  %v926_v2 = vmax.f32 %v841_v38, 0.0  ;;  %v2572_v57 = vld [vmem:[%s3452_s1 + $0xf0] sm:$0xff] }
 0x2fa   :  { %v941_v21 = vmax.f32 %v908_v62, 0.0  ;;  %v933_v15 = vmax.f32 %v898_v53, 0.0  ;;  %v929_v62 = vmax.f32 %v893_v42, 0.0  ;;  %v885_v33 = vadd.f32 %v3157_v13, %v714_v51 }
 0x2fb   :  { %v922_v49 = vmax.f32 %v836_v4, 0.0  ;;  %v967_v16 = vpack.c.bf16 %v926_v2, %v924_v8 }
 0x2fc   :  { %v972_v50 = vpack.c.bf16 %v935_v58, %v933_v15  ;;  %v970_v27 = vpack.c.bf16 %v931_v61, %v929_v62  ;;  %v923_v17 = vmax.f32 %v885_v33, 0.0  ;;  %v2573_v58 = vld [vmem:[%s3452_s1 + $0xf8] sm:$0xff] }
 0x2fe   :  { %v860_v31 = vpop.f32.mrf.mxu0 }
 0x2ff   :  { %v861_v14 = vadd.f32 %v860_v31, %v764_v55  ;;  %v909_v63 = vpop.f32.mrf.mxu1  ;;  %v928_v31 = vmax.f32 %v844_v52, 0.0  ;;  %v2570_v52 = vld [vmem:[%s3452_s1 + $0xe0] sm:$0xff] }
 0x300   :  { %v910_v11 = vadd.f32 %v909_v63, %v764_v55  ;;  %v973_v55 = vpack.c.bf16 %v938_v43, %v936_v29  ;;  %v927_v63 = vmax.f32 %v890_v22, 0.0  ;;  %v689_v43 = vpop.permute.xlu1 %688 }
 0x301   :  { %v942_v3 = vmax.f32 %v861_v14, 0.0  ;;  %v969_v1 = vpack.c.bf16 %v930_v59, %v928_v31  ;;  %v704_v14 = vpop.permute.xlu0 %703  ;;  %v873_v29 = vadd.f32 %v3137_v37, %v689_v43  ;;  %v2567_v37 = vld [vmem:[%s3452_s1 + $0xc8] sm:$0xff] }
 0x302   :  { %v943_v12 = vmax.f32 %v910_v11, 0.0  ;;  %v831_v19 = vadd.f32 %v3147_v48, %v704_v14  ;;  %v694_v11 = vpop.permute.xlu2 %693  ;;  %v880_v23 = vadd.f32 %v3149_v34, %v704_v14  ;;  %v878_v48 = vadd.f32 %v3145_v9, %v699_v25 }
 0x303   :  { %v975_v7 = vpack.c.bf16 %v942_v3, %v940_v56  ;;  %v925_v56 = vmax.f32 %v888_v18, 0.0  ;;  %v829_v3 = vadd.f32 %v3143_v28, %v699_v25  ;;  %v826_v6 = vadd.f32 %v3139_v35, %v694_v11 }
 0x304   :  { %v976_v44 = vpack.c.bf16 %v943_v12, %v941_v21  ;;  %v918_v21 = vmax.f32 %v831_v19, 0.0  ;;  %v824_v12 = vadd.f32 %v3135_v40, %v689_v43  ;;  %v875_v28 = vadd.f32 %v3141_v41, %v694_v11  ;;  %v2566_v40 = vld [vmem:[%s3452_s1 + $0xc0] sm:$0xff] }
 0x305   :  { %1122 = vmatpush.bf16.msra.mxu2 %v975_v7  ;;  %v968_v13 = vpack.c.bf16 %v927_v63, %v925_v56  ;;  %v965_v7 = vpack.c.bf16 %v922_v49, %v920_v5  ;;  %v916_v10 = vmax.f32 %v829_v3, 0.0  ;;  %v919_v45 = vmax.f32 %v880_v23, 0.0 }
 0x306   :  { %1171 = vmatpush.bf16.msra.mxu3 %v976_v44  ;;  %v966_v34 = vpack.c.bf16 %v923_v17, %v921_v32  ;;  %v914_v36 = vmax.f32 %v826_v6, 0.0  ;;  %v917_v44 = vmax.f32 %v878_v48, 0.0  ;;  %v912_v30 = vmax.f32 %v824_v12, 0.0 }
 0x307   :  { %v963_v35 = vpack.c.bf16 %v918_v21, %v916_v10  ;;  %v915_v9 = vmax.f32 %v875_v28, 0.0  ;;  %v913_v53 = vmax.f32 %v873_v29, 0.0 }
 0x308   :  { %v964_v47 = vpack.c.bf16 %v919_v45, %v917_v44  ;;  %v961_v54 = vpack.c.bf16 %v914_v36, %v912_v30  ;;  %v1072_v56 = vpop.permute.xlu1 %1071 }
 0x309   :  { %1123 = vmatpush.bf16.msra.mxu2 %v973_v55  ;;  %v962_v41 = vpack.c.bf16 %v915_v9, %v913_v53  ;;  %v2569_v55 = vld [vmem:[%s3452_s1 + $0xd8] sm:$0xff]  ;;  %v1067_v19 = vpop.permute.xlu0 %1066 }
 0x30a   :  { %1172 = vmatpush.bf16.msra.mxu3 %v974_v20  ;;  %v1057_v11 = vpop.permute.xlu2 %1056 }
 0x30d   :  { %1124 = vmatpush.bf16.msra.mxu2 %v971_v60 }
 0x30e   :  { %1173 = vmatpush.bf16.msra.mxu3 %v972_v50 }
 0x310   :  { %v1047_v5 = vpop.permute.xlu1 %1046 }
 0x311   :  { %1125 = vmatpush.bf16.msra.mxu2 %v969_v1 }
 0x312   :  { %1174 = vmatpush.bf16.msra.mxu3 %v970_v27  ;;  %v1052_v43 = vpop.permute.xlu2 %1051 }
 0x315   :  { %1126 = vmatpush.bf16.msra.mxu2 %v967_v16  ;;  %v1062_v16 = vpop.permute.xlu0 %1061 }
 0x316   :  { %1175 = vmatpush.bf16.msra.mxu3 %v968_v13 }
 0x318   :  { %v1042_v48 = vpop.permute.xlu1 %1041 }
 0x319   :  { %1127 = vmatpush.bf16.msra.mxu2 %v965_v7 }
 0x31a   :  { %1176 = vmatpush.bf16.msra.mxu3 %v966_v34 }
 0x31d   :  { %1128 = vmatpush.bf16.msra.mxu2 %v963_v35  ;;  %v1037_v13 = vpop.permute.xlu0 %1036 }
 0x31e   :  { %1177 = vmatpush.bf16.msra.mxu3 %v964_v47  ;;  %v1027_v47 = vpop.permute.xlu2 %1026 }
 0x321   :  { %1129 = vmatpush.bf16.msra.mxu2 %v961_v54 }
 0x322   :  { %1178 = vmatpush.bf16.msra.mxu3 %v962_v41 }
 0x324   :  { %1130 = vmatmul.bf16.vlgmr.msra.gmra.mxu2 %v2566_v40 }
 0x325   :  { %1179 = vmatmul.bf16.vlgmr.msra.gmra.mxu3 %v2566_v40  ;;  %v1032_v34 = vpop.permute.xlu0 %1031 }
 0x334   :  { %1135 = vmatmul.bf16.gmra.mxu2 %v2567_v37 }
 0x335   :  { %1184 = vmatmul.bf16.gmra.mxu3 %v2567_v37 }
 0x344   :  { %1140 = vmatmul.bf16.gmra.mxu2 %v2568_v26 }
 0x345   :  { %1189 = vmatmul.bf16.gmra.mxu3 %v2568_v26 }
 0x354   :  { %1145 = vmatmul.bf16.gmra.mxu2 %v2569_v55 }
 0x355   :  { %1194 = vmatmul.bf16.gmra.mxu3 %v2569_v55 }
 0x364   :  { %1150 = vmatmul.bf16.gmra.mxu2 %v2570_v52 }
 0x365   :  { %1199 = vmatmul.bf16.gmra.mxu3 %v2570_v52 }
 0x374   :  { %1155 = vmatmul.bf16.gmra.mxu2 %v2571_v24 }
 0x375   :  { %1204 = vmatmul.bf16.gmra.mxu3 %v2571_v24 }
 0x384   :  { %1160 = vmatmul.bf16.gmra.mxu2 %v2572_v57 }
 0x385   :  { %1209 = vmatmul.bf16.gmra.mxu3 %v2572_v57 }
 0x394   :  { %1165 = vmatmul.bf16.gmra.mxu2 %v2573_v58 }
 0x395   :  { %1214 = vmatmul.bf16.gmra.mxu3 %v2573_v58  ;;  %v1017_v58 = vpop.permute.xlu1 %1016 }
 0x3a7   :  { %v3204_v20 = vpop.f32.mrf.mxu2 }
 0x3a8   :  { %v3206_v38 = vpop.f32.mrf.mxu3 }
 0x3af   :  { %v3208_v25 = vpop.f32.mrf.mxu2 }
 0x3b0   :  { %v3210_v42 = vpop.f32.mrf.mxu3 }
 0x3b7   :  { %v3212_v59 = vpop.f32.mrf.mxu2 }
 0x3b8   :  { %v3214_v15 = vpop.f32.mrf.mxu3 }
 0x3bf   :  { %v3216_v60 = vpop.f32.mrf.mxu2 }
 0x3c0   :  { %v3218_v46 = vpop.f32.mrf.mxu3 }
 0x3c7   :  { %v3220_v51 = vpop.f32.mrf.mxu2 }
 0x3c8   :  { %v3222_v22 = vpop.f32.mrf.mxu3 }
 0x3cf   :  { %v3224_v31 = vpop.f32.mrf.mxu2 }
 0x3d0   :  { %v3226_v61 = vpop.f32.mrf.mxu3 }
 0x3d7   :  { %v3228_v50 = vpop.f32.mrf.mxu2 }
 0x3d8   :  { %v3230_v4 = vpop.f32.mrf.mxu3 }
 0x3df   :  { %v1148_v18 = vpop.f32.mrf.mxu2 }
 0x3e0   :  { %v3232_v2 = vpop.f32.mrf.mxu3 }
 0x3e7   :  { %v1151_v62 = vpop.f32.mrf.mxu2 }
 0x3e8   :  { %v1200_v1 = vpop.f32.mrf.mxu3 }
 0x3ef   :  { %v1153_v39 = vpop.f32.mrf.mxu2 }
 0x3f0   :  { %v1202_v14 = vpop.f32.mrf.mxu3  ;;  %v1154_v57 = vadd.f32 %v1153_v39, %v1042_v48  ;;  %v1147_v39 = vadd.f32 %v3228_v50, %v1027_v47 }
 0x3f7   :  { %v1156_v33 = vpop.f32.mrf.mxu2 }
 0x3f8   :  { %v1205_v8 = vpop.f32.mrf.mxu3  ;;  %v1157_v37 = vadd.f32 %v1156_v33, %v1047_v5  ;;  %v1007_v33 = vpop.permute.xlu0 %1006 }
 0x3ff   :  { %v1158_v63 = vpop.f32.mrf.mxu2 }
 0x400   :  { %v1207_v27 = vpop.f32.mrf.mxu3  ;;  %v1159_v30 = vadd.f32 %v1158_v63, %v1052_v43  ;;  %v1152_v63 = vadd.f32 %v1151_v62, %v1037_v13 }
 0x401   :  { %v1208_v26 = vadd.f32 %v1207_v27, %v1052_v43  ;;  %v1201_v27 = vadd.f32 %v1200_v1, %v1037_v13  ;;  %v1142_v13 = vadd.f32 %v3220_v51, %v1017_v58 }
 0x407   :  { %v1161_v0 = vpop.f32.mrf.mxu2 }
 0x408   :  { %v1210_v49 = vpop.f32.mrf.mxu3  ;;  %v1162_v10 = vadd.f32 %v1161_v0, %v1057_v11  ;;  %v1242_v0 = vmax.f32 %v1159_v30, 0.0  ;;  %v1228_v30 = vmax.f32 %v1142_v13, 0.0 }
 0x409   :  { %v1211_v9 = vadd.f32 %v1210_v49, %v1057_v11  ;;  %v1203_v49 = vadd.f32 %v1202_v14, %v1042_v48  ;;  %v1243_v11 = vmax.f32 %v1208_v26, 0.0  ;;  %v1196_v48 = vadd.f32 %v3230_v4, %v1027_v47 }
 0x40a   :  { %v1244_v55 = vmax.f32 %v1162_v10, 0.0  ;;  %v1232_v10 = vmax.f32 %v1147_v39, 0.0 }
 0x40f   :  { %v1163_v3 = vpop.f32.mrf.mxu2 }
 0x410   :  { %v1212_v23 = vpop.f32.mrf.mxu3  ;;  %v1164_v7 = vadd.f32 %v1163_v3, %v1062_v16 }
 0x411   :  { %v1213_v29 = vadd.f32 %v1212_v23, %v1062_v16  ;;  %v1245_v16 = vmax.f32 %v1211_v9, 0.0 }
 0x412   :  { %v1246_v53 = vmax.f32 %v1164_v7, 0.0  ;;  %v1239_v7 = vmax.f32 %v1203_v49, 0.0  ;;  %v2579_v49 = vld [vmem:[%s3452_s1 + $0x128] sm:$0xff] }
 0x413   :  { %v1247_v52 = vmax.f32 %v1213_v29, 0.0  ;;  %v1191_v29 = vadd.f32 %v3222_v22, %v1017_v58 }
 0x414   :  { %v1281_v3 = vpack.c.bf16 %v1246_v53, %v1244_v55 }
 0x415   :  { %v1282_v23 = vpack.c.bf16 %v1247_v52, %v1245_v16  ;;  %v1229_v22 = vmax.f32 %v1191_v29, 0.0  ;;  %v2576_v16 = vld [vmem:[%s3452_s1 + $0x110] sm:$0xff] }
 0x417   :  { %v1166_v17 = vpop.f32.mrf.mxu2 }
 0x418   :  { %v1215_v6 = vpop.f32.mrf.mxu3  ;;  %v1167_v21 = vadd.f32 %v1166_v17, %v1067_v19  ;;  %v1149_v17 = vadd.f32 %v1148_v18, %v1032_v34 }
 0x419   :  { %v1216_v12 = vadd.f32 %v1215_v6, %v1067_v19  ;;  %v1206_v19 = vadd.f32 %v1205_v8, %v1047_v5  ;;  %v1238_v6 = vmax.f32 %v1154_v57, 0.0  ;;  %v1022_v8 = vpop.permute.xlu2 %1021  ;;  %v1198_v5 = vadd.f32 %v3232_v2, %v1032_v34 }
 0x41a   :  { %v1248_v36 = vmax.f32 %v1167_v21, 0.0  ;;  %v1144_v14 = vadd.f32 %v3224_v31, %v1022_v8  ;;  %v1234_v18 = vmax.f32 %v1149_v17, 0.0  ;;  %v1193_v50 = vadd.f32 %v3226_v61, %v1022_v8 }
 0x41b   :  { %v1249_v54 = vmax.f32 %v1216_v12, 0.0  ;;  %v1241_v43 = vmax.f32 %v1206_v19, 0.0  ;;  %v1237_v12 = vmax.f32 %v1201_v27, 0.0 }
 0x41c   :  { %v1230_v31 = vmax.f32 %v1144_v14, 0.0  ;;  %v1275_v4 = vpack.c.bf16 %v1234_v18, %v1232_v10  ;;  %v1231_v9 = vmax.f32 %v1193_v50, 0.0 }
 0x41d   :  { %v1280_v62 = vpack.c.bf16 %v1243_v11, %v1241_v43  ;;  %v1278_v2 = vpack.c.bf16 %v1239_v7, %v1237_v12  ;;  %v2581_v11 = vld [vmem:[%s3452_s1 + $0x138] sm:$0xff] }
 0x41f   :  { %v1168_v32 = vpop.f32.mrf.mxu2 }
 0x420   :  { %v1169_v28 = vadd.f32 %v1168_v32, %v1072_v56  ;;  %v1217_v45 = vpop.f32.mrf.mxu3  ;;  %v1236_v32 = vmax.f32 %v1152_v63, 0.0  ;;  %v2578_v63 = vld [vmem:[%s3452_s1 + $0x120] sm:$0xff] }
 0x421   :  { %v1218_v35 = vadd.f32 %v1217_v45, %v1072_v56  ;;  %v1240_v56 = vmax.f32 %v1157_v37, 0.0  ;;  %v1235_v45 = vmax.f32 %v1198_v5, 0.0  ;;  %v997_v53 = vpop.permute.xlu2 %996 }
 0x422   :  { %v1250_v44 = vmax.f32 %v1169_v28, 0.0  ;;  %v1277_v1 = vpack.c.bf16 %v1238_v6, %v1236_v32  ;;  %v1012_v28 = vpop.permute.xlu1 %1011  ;;  %v1181_v55 = vadd.f32 %v3206_v38, %v997_v53  ;;  %v2575_v38 = vld [vmem:[%s3452_s1 + $0x108] sm:$0xff] }
 0x423   :  { %v1251_v41 = vmax.f32 %v1218_v35, 0.0  ;;  %v1279_v21 = vpack.c.bf16 %v1242_v0, %v1240_v56  ;;  %v1139_v34 = vadd.f32 %v3216_v60, %v1012_v28  ;;  %v1002_v35 = vpop.permute.xlu0 %1001  ;;  %v1188_v51 = vadd.f32 %v3218_v46, %v1012_v28  ;;  %v2580_v56 = vld [vmem:[%s3452_s1 + $0x130] sm:$0xff] }
 0x424   :  { %v1283_v40 = vpack.c.bf16 %v1250_v44, %v1248_v36  ;;  %v1233_v36 = vmax.f32 %v1196_v48, 0.0  ;;  %v1137_v44 = vadd.f32 %v3212_v59, %v1007_v33  ;;  %v1134_v47 = vadd.f32 %v3208_v25, %v1002_v35 }
 0x425   :  { %v1284_v24 = vpack.c.bf16 %v1251_v41, %v1249_v54  ;;  %v1186_v60 = vadd.f32 %v3214_v15, %v1007_v33  ;;  %v1226_v54 = vmax.f32 %v1139_v34, 0.0  ;;  %v1132_v41 = vadd.f32 %v3204_v20, %v997_v53  ;;  %v2574_v20 = vld [vmem:[%s3452_s1 + $0x100] sm:$0xff] }
 0x426   :  { %1430 = vmatpush.bf16.msra.mxu0 %v1283_v40  ;;  %v1276_v61 = vpack.c.bf16 %v1235_v45, %v1233_v36  ;;  %v1273_v40 = vpack.c.bf16 %v1230_v31, %v1228_v30  ;;  %v1183_v59 = vadd.f32 %v3210_v42, %v1002_v35  ;;  %v1224_v37 = vmax.f32 %v1137_v44, 0.0 }
 0x427   :  { %1479 = vmatpush.bf16.msra.mxu1 %v1284_v24  ;;  %v1227_v26 = vmax.f32 %v1188_v51, 0.0  ;;  %v1274_v46 = vpack.c.bf16 %v1231_v9, %v1229_v22  ;;  %v1222_v52 = vmax.f32 %v1134_v47, 0.0  ;;  %v1225_v24 = vmax.f32 %v1186_v60, 0.0 }
 0x428   :  { %v1271_v25 = vpack.c.bf16 %v1226_v54, %v1224_v37  ;;  %v1220_v57 = vmax.f32 %v1132_v41, 0.0  ;;  %v1223_v15 = vmax.f32 %v1183_v59, 0.0  ;;  %v1221_v19 = vmax.f32 %v1181_v55, 0.0 }
 0x429   :  { %v1272_v58 = vpack.c.bf16 %v1227_v26, %v1225_v24  ;;  %v1380_v54 = vpop.permute.xlu2 %1379 }
 0x42a   :  { %1431 = vmatpush.bf16.msra.mxu0 %v1281_v3  ;;  %v1269_v0 = vpack.c.bf16 %v1222_v52, %v1220_v57  ;;  %v1270_v42 = vpack.c.bf16 %v1223_v15, %v1221_v19  ;;  %v2577_v3 = vld [vmem:[%s3452_s1 + $0x118] sm:$0xff]  ;;  %v1375_v39 = vpop.permute.xlu1 %1374 }
 0x42b   :  { %1480 = vmatpush.bf16.msra.mxu1 %v1282_v23  ;;  %v1365_v32 = vpop.permute.xlu0 %1364 }
 0x42e   :  { %1432 = vmatpush.bf16.msra.mxu0 %v1279_v21 }
 0x42f   :  { %1481 = vmatpush.bf16.msra.mxu1 %v1280_v62 }
 0x431   :  { %v1355_v41 = vpop.permute.xlu2 %1354 }
 0x432   :  { %1433 = vmatpush.bf16.msra.mxu0 %v1277_v1  ;;  %v1370_v62 = vpop.permute.xlu1 %1369 }
 0x433   :  { %1482 = vmatpush.bf16.msra.mxu1 %v1278_v2  ;;  %v1360_v18 = vpop.permute.xlu0 %1359 }
 0x436   :  { %1434 = vmatpush.bf16.msra.mxu0 %v1275_v4 }
 0x437   :  { %1483 = vmatpush.bf16.msra.mxu1 %v1276_v61 }
 0x43a   :  { %1435 = vmatpush.bf16.msra.mxu0 %v1273_v40  ;;  %v3297_v12 = vpop.permute.xlu1 %1344 }
 0x43b   :  { %1484 = vmatpush.bf16.msra.mxu1 %v1274_v46  ;;  %v3301_v28 = vpop.permute.xlu0 %1334  ;;  %v1350_v46 = vpop.permute.xlu2 %1349 }
 0x43e   :  { %1436 = vmatpush.bf16.msra.mxu0 %v1271_v25 }
 0x43f   :  { %1485 = vmatpush.bf16.msra.mxu1 %v1272_v58 }
 0x442   :  { %1437 = vmatpush.bf16.msra.mxu0 %v1269_v0  ;;  %v3304_v10 = vpop.permute.xlu1 %1339 }
 0x443   :  { %1486 = vmatpush.bf16.msra.mxu1 %v1270_v42 }
 0x445   :  { %1438 = vmatmul.bf16.vlgmr.msra.gmra.mxu0 %v2574_v20 }
 0x446   :  { %1487 = vmatmul.bf16.vlgmr.msra.gmra.mxu1 %v2574_v20 }
 0x455   :  { %1443 = vmatmul.bf16.gmra.mxu0 %v2575_v38 }
 0x456   :  { %1492 = vmatmul.bf16.gmra.mxu1 %v2575_v38 }
 0x465   :  { %1448 = vmatmul.bf16.gmra.mxu0 %v2576_v16 }
 0x466   :  { %1497 = vmatmul.bf16.gmra.mxu1 %v2576_v16 }
 0x475   :  { %1453 = vmatmul.bf16.gmra.mxu0 %v2577_v3 }
 0x476   :  { %1502 = vmatmul.bf16.gmra.mxu1 %v2577_v3 }
 0x485   :  { %1458 = vmatmul.bf16.gmra.mxu0 %v2578_v63 }
 0x486   :  { %1507 = vmatmul.bf16.gmra.mxu1 %v2578_v63 }
 0x495   :  { %1463 = vmatmul.bf16.gmra.mxu0 %v2579_v49 }
 0x496   :  { %1512 = vmatmul.bf16.gmra.mxu1 %v2579_v49 }
 0x4a5   :  { %1468 = vmatmul.bf16.gmra.mxu0 %v2580_v56 }
 0x4a6   :  { %1517 = vmatmul.bf16.gmra.mxu1 %v2580_v56 }
 0x4b5   :  { %1473 = vmatmul.bf16.gmra.mxu0 %v2581_v11 }
 0x4b6   :  { %1522 = vmatmul.bf16.gmra.mxu1 %v2581_v11 }
 0x4c2   :  { %v3273_v23 = vpop.f32.mrf.mxu0 }
 0x4c3   :  { %v3275_v17 = vpop.f32.mrf.mxu1 }
 0x4ca   :  { %v3277_v33 = vpop.f32.mrf.mxu0 }
 0x4cb   :  { %v3279_v27 = vpop.f32.mrf.mxu1 }
 0x4d2   :  { %v3281_v6 = vpop.f32.mrf.mxu0 }
 0x4d3   :  { %v3283_v43 = vpop.f32.mrf.mxu1 }
 0x4da   :  { %v3285_v21 = vpop.f32.mrf.mxu0 }
 0x4db   :  { %v3287_v8 = vpop.f32.mrf.mxu1 }
 0x4e2   :  { %v3289_v5 = vpop.f32.mrf.mxu0 }
 0x4e3   :  { %v3291_v7 = vpop.f32.mrf.mxu1 }
 0x4ea   :  { %v3293_v14 = vpop.f32.mrf.mxu0 }
 0x4eb   :  { %v3295_v48 = vpop.f32.mrf.mxu1 }
 0x4f2   :  { %v1454_v1 = vpop.f32.mrf.mxu0 }
 0x4f3   :  { %v3299_v13 = vpop.f32.mrf.mxu1  ;;  %v1455_v50 = vadd.f32 %v1454_v1, %v3301_v28 }
 0x4f5   :  { %v1540_v29 = vmax.f32 %v1455_v50, 0.0 }
 0x4fa   :  { %v1456_v45 = vpop.f32.mrf.mxu0 }
 0x4fb   :  { %v1457_v2 = vadd.f32 %v1456_v45, %v3304_v10  ;;  %v3307_v34 = vpop.f32.mrf.mxu1 }
 0x4fd   :  { %v1542_v31 = vmax.f32 %v1457_v2, 0.0 }
 0x4ff   :  { %v3309_v36 = vpack.c.bf16 %v1542_v31, %v1540_v29 }
 0x502   :  { %v1459_v4 = vpop.f32.mrf.mxu0 }
 0x503   :  { %v1508_v44 = vpop.f32.mrf.mxu1 }
 0x50a   :  { %v1461_v35 = vpop.f32.mrf.mxu0 }
 0x50b   :  { %v1510_v51 = vpop.f32.mrf.mxu1 }
 0x512   :  { %v1464_v30 = vpop.f32.mrf.mxu0 }
 0x513   :  { %v1513_v9 = vpop.f32.mrf.mxu1  ;;  %v1465_v56 = vadd.f32 %v1464_v30, %v1355_v41  ;;  %v1315_v30 = vpop.permute.xlu1 %1314 }
 0x514   :  { %v1514_v2 = vadd.f32 %v1513_v9, %v1355_v41  ;;  %v1506_v9 = vadd.f32 %v3307_v34, %v3304_v10 }
 0x51a   :  { %v1466_v61 = vpop.f32.mrf.mxu0 }
 0x51b   :  { %v1515_v47 = vpop.f32.mrf.mxu1  ;;  %v1467_v42 = vadd.f32 %v1466_v61, %v1360_v18  ;;  %v1460_v61 = vadd.f32 %v1459_v4, %v3297_v12 }
 0x51c   :  { %v1516_v11 = vadd.f32 %v1515_v47, %v1360_v18  ;;  %v1509_v18 = vadd.f32 %v1508_v44, %v3297_v12 }
 0x51d   :  { %v1550_v29 = vmax.f32 %v1467_v42, 0.0  ;;  %v1544_v41 = vmax.f32 %v1460_v61, 0.0 }
 0x522   :  { %v1469_v53 = vpop.f32.mrf.mxu0 }
 0x523   :  { %v1518_v60 = vpop.f32.mrf.mxu1  ;;  %v1470_v57 = vadd.f32 %v1469_v53, %v1365_v32  ;;  %v1325_v53 = vpop.permute.xlu2 %1324 }
 0x524   :  { %v1519_v38 = vadd.f32 %v1518_v60, %v1365_v32  ;;  %v1511_v32 = vadd.f32 %v1510_v51, %v1350_v46  ;;  %v1548_v60 = vmax.f32 %v1465_v56, 0.0  ;;  %v1504_v51 = vadd.f32 %v3299_v13, %v3301_v28  ;;  %v1310_v28 = vpop.permute.xlu1 %1309 }
 0x525   :  { %v1552_v1 = vmax.f32 %v1470_v57, 0.0  ;;  %v1450_v12 = vadd.f32 %v3289_v5, %v1325_v53  ;;  %v1445_v13 = vadd.f32 %v3281_v6, %v1315_v30  ;;  %v1491_v6 = vadd.f32 %v3279_v27, %v1310_v28 }
 0x526   :  { %v1553_v31 = vmax.f32 %v1519_v38, 0.0 }
 0x52a   :  { %v1471_v22 = vpop.f32.mrf.mxu0 }
 0x52b   :  { %v1520_v40 = vpop.f32.mrf.mxu1  ;;  %v1472_v52 = vadd.f32 %v1471_v22, %v1370_v62  ;;  %v1320_v10 = vpop.permute.xlu2 %1319 }
 0x52c   :  { %v1521_v58 = vadd.f32 %v1520_v40, %v1370_v62  ;;  %v1549_v40 = vmax.f32 %v1514_v2, 0.0  ;;  %v1447_v34 = vadd.f32 %v3285_v21, %v1320_v10  ;;  %v1494_v21 = vadd.f32 %v3283_v43, %v1315_v30  ;;  %v2586_v2 = vld [vmem:[%s3452_s1 + $0x160] sm:$0xff] }
 0x52d   :  { %v1554_v16 = vmax.f32 %v1472_v52, 0.0  ;;  %v1543_v52 = vmax.f32 %v1506_v9, 0.0  ;;  %v1531_v43 = vmax.f32 %v1491_v6, 0.0 }
 0x52e   :  { %v1555_v50 = vmax.f32 %v1521_v58, 0.0  ;;  %v1536_v58 = vmax.f32 %v1450_v12, 0.0 }
 0x52f   :  { %v1589_v62 = vpack.c.bf16 %v1554_v16, %v1552_v1  ;;  %v1532_v16 = vmax.f32 %v1445_v13, 0.0 }
 0x530   :  { %v1590_v22 = vpack.c.bf16 %v1555_v50, %v1553_v31 }
 0x532   :  { %v1474_v59 = vpop.f32.mrf.mxu0 }
 0x533   :  { %v1523_v37 = vpop.f32.mrf.mxu1  ;;  %v1475_v26 = vadd.f32 %v1474_v59, %v1375_v39  ;;  %v1587_v59 = vpack.c.bf16 %v1550_v29, %v1548_v60  ;;  %v2587_v29 = vld [vmem:[%s3452_s1 + $0x168] sm:$0xff]  ;;  %v3348_v31 = vpop.permute.xlu2 %1682  ;;  %v2589_v60 = vld [vmem:[%s3452_s1 + $0x178] sm:$0xff] }
 0x534   :  { %v1524_v24 = vadd.f32 %v1523_v37, %v1375_v39  ;;  %v1462_v39 = vadd.f32 %v1461_v35, %v1350_v46  ;;  %v1330_v35 = vpop.permute.xlu0 %1329  ;;  %v1547_v37 = vmax.f32 %v1511_v32, 0.0  ;;  %v1545_v46 = vmax.f32 %v1509_v18, 0.0 }
 0x535   :  { %v1556_v19 = vmax.f32 %v1475_v26, 0.0  ;;  %v1452_v4 = vadd.f32 %v3293_v14, %v1330_v35  ;;  %v1501_v44 = vadd.f32 %v3295_v48, %v1330_v35  ;;  %v1541_v14 = vmax.f32 %v1504_v51, 0.0 }
 0x536   :  { %v1557_v3 = vmax.f32 %v1524_v24, 0.0  ;;  %v1546_v47 = vmax.f32 %v1462_v39, 0.0  ;;  %v1586_v24 = vpack.c.bf16 %v1547_v37, %v1545_v46  ;;  %v2585_v39 = vld [vmem:[%s3452_s1 + $0x158] sm:$0xff] }
 0x537   :  { %v1538_v57 = vmax.f32 %v1452_v4, 0.0  ;;  %v1539_v5 = vmax.f32 %v1501_v44, 0.0  ;;  %v1584_v48 = vpack.c.bf16 %v1543_v52, %v1541_v14 }
 0x539   :  { %v1581_v42 = vpack.c.bf16 %v1538_v57, %v1536_v58 }
 0x53a   :  { %v1476_v55 = vpop.f32.mrf.mxu0 }
 0x53b   :  { %v1477_v25 = vadd.f32 %v1476_v55, %v1380_v54  ;;  %v1525_v15 = vpop.f32.mrf.mxu1  ;;  %v1585_v55 = vpack.c.bf16 %v1546_v47, %v1544_v41  ;;  %v3355_v61 = vpop.permute.xlu2 %1677 }
 0x53c   :  { %v1526_v20 = vadd.f32 %v1525_v15, %v1380_v54  ;;  %v1551_v54 = vmax.f32 %v1516_v11, 0.0  ;;  %v1496_v15 = vadd.f32 %v3287_v8, %v1320_v10 }
 0x53d   :  { %v1558_v0 = vmax.f32 %v1477_v25, 0.0  ;;  %v1499_v25 = vadd.f32 %v3291_v7, %v1325_v53  ;;  %v3353_v53 = vpop.permute.xlu1 %1672 }
 0x53e   :  { %v1559_v49 = vmax.f32 %v1526_v20, 0.0  ;;  %v1588_v26 = vpack.c.bf16 %v1551_v54, %v1549_v40  ;;  %v1534_v20 = vmax.f32 %v1447_v34, 0.0  ;;  %v1535_v8 = vmax.f32 %v1496_v15, 0.0 }
 0x53f   :  { %v1591_v63 = vpack.c.bf16 %v1558_v0, %v1556_v19  ;;  %v1442_v19 = vadd.f32 %v3277_v33, %v1310_v28  ;;  %v1305_v0 = vpop.permute.xlu0 %1304  ;;  %v1537_v7 = vmax.f32 %v1499_v25, 0.0 }
 0x540   :  { %v1592_v45 = vpack.c.bf16 %v1559_v49, %v1557_v3  ;;  %v1440_v38 = vadd.f32 %v3273_v23, %v1305_v0  ;;  %v1533_v49 = vmax.f32 %v1494_v21, 0.0  ;;  %v1579_v33 = vpack.c.bf16 %v1534_v20, %v1532_v16  ;;  %v2582_v23 = vld [vmem:[%s3452_s1 + $0x140] sm:$0xff] }
 0x541   :  { %1738 = vmatpush.bf16.msrb.mxu2 %v1591_v63  ;;  %v1582_v3 = vpack.c.bf16 %v1539_v5, %v1537_v7  ;;  %v1530_v63 = vmax.f32 %v1442_v19, 0.0 }
 0x542   :  { %1787 = vmatpush.bf16.msrb.mxu3 %v1592_v45  ;;  %v1528_v56 = vmax.f32 %v1440_v38, 0.0  ;;  %v1580_v11 = vpack.c.bf16 %v1535_v8, %v1533_v49  ;;  %v2584_v45 = vld [vmem:[%s3452_s1 + $0x150] sm:$0xff] }
 0x543   :  { %v3362_v54 = vpop.permute.xlu2 %1652 }
 0x544   :  { %v1577_v50 = vpack.c.bf16 %v1530_v63, %v1528_v56 }
 0x545   :  { %1739 = vmatpush.bf16.msrb.mxu2 %v1589_v62  ;;  %v2588_v62 = vld [vmem:[%s3452_s1 + $0x170] sm:$0xff]  ;;  %v3357_v32 = vpop.permute.xlu1 %1667 }
 0x546   :  { %1788 = vmatpush.bf16.msrb.mxu3 %v1590_v22 }
 0x547   :  { %v3364_v22 = vpop.permute.xlu0 %1687 }
 0x549   :  { %1740 = vmatpush.bf16.msrb.mxu2 %v1587_v59 }
 0x54a   :  { %1789 = vmatpush.bf16.msrb.mxu3 %v1588_v26 }
 0x54b   :  { %v1648_v18 = vpop.permute.xlu2 %1647 }
 0x54d   :  { %1741 = vmatpush.bf16.msrb.mxu2 %v1585_v55  ;;  %v1643_v30 = vpop.permute.xlu1 %1642 }
 0x54e   :  { %1790 = vmatpush.bf16.msrb.mxu3 %v1586_v24 }
 0x54f   :  { %v3366_v47 = vpop.permute.xlu0 %1662 }
 0x551   :  { %1742 = vmatpush.bf16.msrb.mxu2 %v3309_v36  ;;  %v1489_v36 = vadd.f32 %v3275_v17, %v1305_v0  ;;  %v2583_v17 = vld [vmem:[%s3452_s1 + $0x148] sm:$0xff] }
 0x552   :  { %1791 = vmatpush.bf16.msrb.mxu3 %v1584_v48 }
 0x553   :  { %v1529_v1 = vmax.f32 %v1489_v36, 0.0  ;;  %v1623_v59 = vpop.permute.xlu2 %1622 }
 0x555   :  { %1743 = vmatpush.bf16.msrb.mxu2 %v1581_v42  ;;  %v1578_v27 = vpack.c.bf16 %v1531_v43, %v1529_v1  ;;  %v1638_v40 = vpop.permute.xlu1 %1637 }
 0x556   :  { %1792 = vmatpush.bf16.msrb.mxu3 %v1582_v3 }
 0x557   :  { %v3368_v41 = vpop.permute.xlu0 %1657 }
 0x559   :  { %1744 = vmatpush.bf16.msrb.mxu2 %v1579_v33 }
 0x55a   :  { %1793 = vmatpush.bf16.msrb.mxu3 %v1580_v11 }
 0x55b   :  { %v1618_v4 = vpop.permute.xlu2 %1617 }
 0x55d   :  { %1745 = vmatpush.bf16.msrb.mxu2 %v1577_v50  ;;  %v1613_v37 = vpop.permute.xlu1 %1612 }
 0x55e   :  { %1794 = vmatpush.bf16.msrb.mxu3 %v1578_v27 }
 0x55f   :  { %v1633_v57 = vpop.permute.xlu0 %1632 }
 0x560   :  { %1746 = vmatmul.bf16.vlgmr.msrb.gmra.mxu2 %v2582_v23 }
 0x561   :  { %1795 = vmatmul.bf16.vlgmr.msrb.gmra.mxu3 %v2582_v23 }
 0x567   :  { %v1628_v58 = vpop.permute.xlu0 %1627 }
 0x570   :  { %1751 = vmatmul.bf16.gmra.mxu2 %v2583_v17 }
 0x571   :  { %1800 = vmatmul.bf16.gmra.mxu3 %v2583_v17 }
 0x580   :  { %1756 = vmatmul.bf16.gmra.mxu2 %v2584_v45 }
 0x581   :  { %1805 = vmatmul.bf16.gmra.mxu3 %v2584_v45 }
 0x590   :  { %1761 = vmatmul.bf16.gmra.mxu2 %v2585_v39 }
 0x591   :  { %1810 = vmatmul.bf16.gmra.mxu3 %v2585_v39 }
 0x5a0   :  { %1766 = vmatmul.bf16.gmra.mxu2 %v2586_v2 }
 0x5a1   :  { %1815 = vmatmul.bf16.gmra.mxu3 %v2586_v2 }
 0x5b0   :  { %1771 = vmatmul.bf16.gmra.mxu2 %v2587_v29 }
 0x5b1   :  { %1820 = vmatmul.bf16.gmra.mxu3 %v2587_v29 }
 0x5c0   :  { %1776 = vmatmul.bf16.gmra.mxu2 %v2588_v62 }
 0x5c1   :  { %1825 = vmatmul.bf16.gmra.mxu3 %v2588_v62 }
 0x5d0   :  { %1781 = vmatmul.bf16.gmra.mxu2 %v2589_v60 }
 0x5d1   :  { %1830 = vmatmul.bf16.gmra.mxu3 %v2589_v60 }
 0x5e3   :  { %v1747_v35 = vpop.f32.mrf.mxu2 }
 0x5e4   :  { %v1796_v9 = vpop.f32.mrf.mxu3  ;;  %v1748_v26 = vadd.f32 %v1747_v35, %v1613_v37 }
 0x5e5   :  { %v1797_v46 = vadd.f32 %v1796_v9, %v1613_v37 }
 0x5e6   :  { %v1836_v44 = vmax.f32 %v1748_v26, 0.0 }
 0x5e7   :  { %v1837_v10 = vmax.f32 %v1797_v46, 0.0 }
 0x5eb   :  { %v1749_v51 = vpop.f32.mrf.mxu2 }
 0x5ec   :  { %v1750_v55 = vadd.f32 %v1749_v51, %v1618_v4  ;;  %v1798_v12 = vpop.f32.mrf.mxu3 }
 0x5ed   :  { %v1799_v24 = vadd.f32 %v1798_v12, %v1618_v4 }
 0x5ee   :  { %v1838_v52 = vmax.f32 %v1750_v55, 0.0 }
 0x5ef   :  { %v1839_v25 = vmax.f32 %v1799_v24, 0.0 }
 0x5f0   :  { %v3370_v34 = vpack.c.bf16 %v1838_v52, %v1836_v44 }
 0x5f1   :  { %v3372_v14 = vpack.c.bf16 %v1839_v25, %v1837_v10 }
 0x5f3   :  { %v1752_v13 = vpop.f32.mrf.mxu2 }
 0x5f4   :  { %v1801_v28 = vpop.f32.mrf.mxu3  ;;  %v1753_v15 = vadd.f32 %v1752_v13, %v1623_v59 }
 0x5f5   :  { %v1802_v48 = vadd.f32 %v1801_v28, %v1623_v59 }
 0x5f6   :  { %v1840_v21 = vmax.f32 %v1753_v15, 0.0 }
 0x5f7   :  { %v1841_v42 = vmax.f32 %v1802_v48, 0.0 }
 0x5fb   :  { %v1754_v5 = vpop.f32.mrf.mxu2 }
 0x5fc   :  { %v1755_v19 = vadd.f32 %v1754_v5, %v1628_v58  ;;  %v1803_v0 = vpop.f32.mrf.mxu3 }
 0x5fd   :  { %v1804_v7 = vadd.f32 %v1803_v0, %v1628_v58 }
 0x5fe   :  { %v1842_v20 = vmax.f32 %v1755_v19, 0.0 }
 0x5ff   :  { %v1843_v6 = vmax.f32 %v1804_v7, 0.0 }
 0x600   :  { %v3374_v38 = vpack.c.bf16 %v1842_v20, %v1840_v21 }
 0x601   :  { %v3376_v16 = vpack.c.bf16 %v1843_v6, %v1841_v42 }
 0x603   :  { %v1757_v8 = vpop.f32.mrf.mxu2 }
 0x604   :  { %v1806_v3 = vpop.f32.mrf.mxu3  ;;  %v1758_v36 = vadd.f32 %v1757_v8, %v1633_v57 }
 0x605   :  { %v1807_v49 = vadd.f32 %v1806_v3, %v1633_v57 }
 0x606   :  { %v1844_v43 = vmax.f32 %v1758_v36, 0.0 }
 0x607   :  { %v1845_v50 = vmax.f32 %v1807_v49, 0.0 }
 0x60b   :  { %v1759_v63 = vpop.f32.mrf.mxu2 }
 0x60c   :  { %v1760_v33 = vadd.f32 %v1759_v63, %v1638_v40  ;;  %v1808_v56 = vpop.f32.mrf.mxu3 }
 0x60d   :  { %v1809_v1 = vadd.f32 %v1808_v56, %v1638_v40 }
 0x60e   :  { %v1846_v11 = vmax.f32 %v1760_v33, 0.0 }
 0x60f   :  { %v1847_v27 = vmax.f32 %v1809_v1, 0.0 }
 0x610   :  { %v3378_v23 = vpack.c.bf16 %v1846_v11, %v1844_v43 }
 0x611   :  { %v3380_v17 = vpack.c.bf16 %v1847_v27, %v1845_v50 }
 0x613   :  { %v1762_v45 = vpop.f32.mrf.mxu2 }
 0x614   :  { %v1811_v39 = vpop.f32.mrf.mxu3  ;;  %v1763_v2 = vadd.f32 %v1762_v45, %v1643_v30 }
 0x615   :  { %v1812_v62 = vadd.f32 %v1811_v39, %v1643_v30 }
 0x616   :  { %v1848_v35 = vmax.f32 %v1763_v2, 0.0 }
 0x617   :  { %v1849_v26 = vmax.f32 %v1812_v62, 0.0 }
 0x61b   :  { %v1764_v29 = vpop.f32.mrf.mxu2 }
 0x61c   :  { %v1765_v60 = vadd.f32 %v1764_v29, %v1648_v18  ;;  %v1813_v59 = vpop.f32.mrf.mxu3 }
 0x61d   :  { %v1814_v37 = vadd.f32 %v1813_v59, %v1648_v18 }
 0x61e   :  { %v1850_v9 = vmax.f32 %v1765_v60, 0.0 }
 0x61f   :  { %v1851_v40 = vmax.f32 %v1814_v37, 0.0 }
 0x620   :  { %v3382_v4 = vpack.c.bf16 %v1850_v9, %v1848_v35 }
 0x621   :  { %v3384_v51 = vpack.c.bf16 %v1851_v40, %v1849_v26 }
 0x623   :  { %v1767_v46 = vpop.f32.mrf.mxu2 }
 0x624   :  { %v1816_v55 = vpop.f32.mrf.mxu3  ;;  %v1768_v39 = vadd.f32 %v1767_v46, %v3362_v54 }
 0x625   :  { %v1817_v60 = vadd.f32 %v1816_v55, %v3362_v54  ;;  %v2590_v54 = vld [vmem:[%s3452_s1 + $0x180] sm:$0xff] }
 0x627   :  { %v1853_v40 = vmax.f32 %v1817_v60, 0.0 }
 0x62b   :  { %v1769_v12 = vpop.f32.mrf.mxu2 }
 0x62c   :  { %v1818_v44 = vpop.f32.mrf.mxu3 }
 0x62d   :  { %v1819_v2 = vadd.f32 %v1818_v44, %v3368_v41 }
 0x62f   :  { %v1855_v37 = vmax.f32 %v1819_v2, 0.0 }
 0x633   :  { %v1772_v52 = vpop.f32.mrf.mxu2 }
 0x634   :  { %v1821_v24 = vpop.f32.mrf.mxu3 }
 0x63b   :  { %v1774_v10 = vpop.f32.mrf.mxu2 }
 0x63c   :  { %v1823_v25 = vpop.f32.mrf.mxu3  ;;  %v1775_v3 = vadd.f32 %v1774_v10, %v3357_v32 }
 0x63d   :  { %v1824_v43 = vadd.f32 %v1823_v25, %v3357_v32 }
 0x63e   :  { %v1858_v27 = vmax.f32 %v1775_v3, 0.0 }
 0x63f   :  { %v1859_v62 = vmax.f32 %v1824_v43, 0.0 }
 0x643   :  { %v1777_v30 = vpop.f32.mrf.mxu2 }
 0x644   :  { %v1826_v57 = vpop.f32.mrf.mxu3  ;;  %v1778_v21 = vadd.f32 %v1777_v30, %v3353_v53 }
 0x645   :  { %v1827_v36 = vadd.f32 %v1826_v57, %v3353_v53 }
 0x646   :  { %v1860_v11 = vmax.f32 %v1778_v21, 0.0 }
 0x647   :  { %v1861_v45 = vmax.f32 %v1827_v36, 0.0 }
 0x64b   :  { %v1779_v13 = vpop.f32.mrf.mxu2 }
 0x64c   :  { %v1828_v28 = vpop.f32.mrf.mxu3  ;;  %v1780_v48 = vadd.f32 %v1779_v13, %v3355_v61 }
 0x64d   :  { %v1829_v7 = vadd.f32 %v1828_v28, %v3355_v61  ;;  %v1770_v61 = vadd.f32 %v1769_v12, %v3368_v41  ;;  %v1894_v41 = vpack.c.bf16 %v1855_v37, %v1853_v40 }
 0x64e   :  { %v1862_v63 = vmax.f32 %v1780_v48, 0.0 }
 0x64f   :  { %v1863_v1 = vmax.f32 %v1829_v7, 0.0  ;;  %v1854_v59 = vmax.f32 %v1770_v61, 0.0 }
 0x650   :  { %v1897_v53 = vpack.c.bf16 %v1862_v63, %v1860_v11 }
 0x651   :  { %v1898_v32 = vpack.c.bf16 %v1863_v1, %v1861_v45 }
 0x653   :  { %v1782_v15 = vpop.f32.mrf.mxu2 }
 0x654   :  { %v1831_v18 = vpop.f32.mrf.mxu3  ;;  %v1783_v58 = vadd.f32 %v1782_v15, %v3348_v31 }
 0x655   :  { %v1832_v19 = vadd.f32 %v1831_v18, %v3348_v31  ;;  %v1773_v31 = vadd.f32 %v1772_v52, %v3366_v47 }
 0x656   :  { %v1864_v42 = vmax.f32 %v1783_v58, 0.0 }
 0x657   :  { %v1865_v49 = vmax.f32 %v1832_v19, 0.0  ;;  %v1856_v29 = vmax.f32 %v1773_v31, 0.0 }
 0x659   :  { %v1895_v9 = vpack.c.bf16 %v1858_v27, %v1856_v29 }
 0x65b   :  { %v1784_v5 = vpop.f32.mrf.mxu2 }
 0x65c   :  { %v1785_v0 = vadd.f32 %v1784_v5, %v3364_v22  ;;  %v1833_v20 = vpop.f32.mrf.mxu3 }
 0x65d   :  { %v1834_v8 = vadd.f32 %v1833_v20, %v3364_v22  ;;  %v1822_v22 = vadd.f32 %v1821_v24, %v3366_v47  ;;  %v1852_v47 = vmax.f32 %v1768_v39, 0.0  ;;  %v1926_v24 = vpop.permute.xlu1 %1925 }
 0x65e   :  { %v1866_v6 = vmax.f32 %v1785_v0, 0.0 }
 0x65f   :  { %v1867_v56 = vmax.f32 %v1834_v8, 0.0  ;;  %v1857_v35 = vmax.f32 %v1822_v22, 0.0  ;;  %v1893_v46 = vpack.c.bf16 %v1854_v59, %v1852_v47 }
 0x660   :  { %v1899_v33 = vpack.c.bf16 %v1866_v6, %v1864_v42 }
 0x661   :  { %v1900_v50 = vpack.c.bf16 %v1867_v56, %v1865_v49  ;;  %v1896_v26 = vpack.c.bf16 %v1859_v62, %v1857_v35 }
 0x662   :  { %2032 = vmatpush.bf16.msrb.mxu0 %v1899_v33  ;;  %2600 = vmatpush.bf16.msra.mxu2 %v1899_v33 }
 0x663   :  { %2067 = vmatpush.bf16.msrb.mxu1 %v1900_v50 }
 0x666   :  { %2033 = vmatpush.bf16.msrb.mxu0 %v1897_v53  ;;  %2601 = vmatpush.bf16.msra.mxu2 %v1897_v53 }
 0x667   :  { %2068 = vmatpush.bf16.msrb.mxu1 %v1898_v32 }
 0x66a   :  { %2034 = vmatpush.bf16.msrb.mxu0 %v1895_v9  ;;  %2602 = vmatpush.bf16.msra.mxu2 %v1895_v9 }
 0x66b   :  { %2069 = vmatpush.bf16.msrb.mxu1 %v1896_v26 }
 0x66e   :  { %2035 = vmatpush.bf16.msrb.mxu0 %v1893_v46  ;;  %2603 = vmatpush.bf16.msra.mxu2 %v1893_v46 }
 0x66f   :  { %2070 = vmatpush.bf16.msrb.mxu1 %v1894_v41 }
 0x672   :  { %2036 = vmatpush.bf16.msrb.mxu0 %v3382_v4  ;;  %2604 = vmatpush.bf16.msra.mxu2 %v3382_v4  ;;  %v2596_v4 = vld [vmem:[%s3452_s1 + $0x1b0] sm:$0xff] }
 0x673   :  { %2071 = vmatpush.bf16.msrb.mxu1 %v3384_v51  ;;  %v1921_v51 = vpop.permute.xlu0 %1920 }
 0x676   :  { %2037 = vmatpush.bf16.msrb.mxu0 %v3378_v23  ;;  %2605 = vmatpush.bf16.msra.mxu2 %v3378_v23  ;;  %v2591_v23 = vld [vmem:[%s3452_s1 + $0x188] sm:$0xff] }
 0x677   :  { %2072 = vmatpush.bf16.msrb.mxu1 %v3380_v17  ;;  %v2595_v17 = vld [vmem:[%s3452_s1 + $0x1a8] sm:$0xff] }
 0x67a   :  { %2038 = vmatpush.bf16.msrb.mxu0 %v3374_v38  ;;  %2606 = vmatpush.bf16.msra.mxu2 %v3374_v38  ;;  %v2592_v38 = vld [vmem:[%s3452_s1 + $0x190] sm:$0xff] }
 0x67b   :  { %2073 = vmatpush.bf16.msrb.mxu1 %v3376_v16  ;;  %v2597_v16 = vld [vmem:[%s3452_s1 + $0x1b8] sm:$0xff] }
 0x67e   :  { %2039 = vmatpush.bf16.msrb.mxu0 %v3370_v34  ;;  %2607 = vmatpush.bf16.msra.mxu2 %v3370_v34  ;;  %v2593_v34 = vld [vmem:[%s3452_s1 + $0x198] sm:$0xff] }
 0x67f   :  { %2074 = vmatpush.bf16.msrb.mxu1 %v3372_v14  ;;  %v2594_v14 = vld [vmem:[%s3452_s1 + $0x1a0] sm:$0xff] }
 0x681   :  { %2040 = vmatmul.bf16.vlgmr.msrb.gmra.mxu0 %v2590_v54  ;;  %2063 = vmatmul.bf16.vlgmr.msra.gmra.mxu2 %v2597_v16 }
 0x682   :  { %2075 = vmatmul.bf16.vlgmr.msrb.gmra.mxu1 %v2590_v54 }
 0x691   :  { %2045 = vmatmul.bf16.gmra.mxu0 %v2591_v23 }
 0x692   :  { %2080 = vmatmul.bf16.gmra.mxu1 %v2591_v23 }
 0x6a1   :  { %2048 = vmatmul.bf16.gmra.mxu0 %v2592_v38 }
 0x6a2   :  { %2083 = vmatmul.bf16.gmra.mxu1 %v2592_v38 }
 0x6b1   :  { %2051 = vmatmul.bf16.gmra.mxu0 %v2593_v34 }
 0x6b2   :  { %2086 = vmatmul.bf16.gmra.mxu1 %v2593_v34 }
 0x6c1   :  { %2054 = vmatmul.bf16.gmra.mxu0 %v2594_v14 }
 0x6c2   :  { %2089 = vmatmul.bf16.gmra.mxu1 %v2594_v14 }
 0x6d1   :  { %2057 = vmatmul.bf16.gmra.mxu0 %v2595_v17 }
 0x6d2   :  { %2092 = vmatmul.bf16.gmra.mxu1 %v2595_v17 }
 0x6e1   :  { %2060 = vmatmul.bf16.gmra.mxu0 %v2596_v4 }
 0x6e2   :  { %2095 = vmatmul.bf16.gmra.mxu1 %v2596_v4 }
 0x6f2   :  { %2098 = vmatmul.bf16.gmra.mxu1 %v2597_v16 }
 0x6fe   :  { %v2041_v55 = vpop.f32.mrf.mxu0 }
 0x6ff   :  { %v2042_v12 = vadd.f32 %v2041_v55, %v1921_v51  ;;  %v2076_v44 = vpop.f32.mrf.mxu1 }
 0x700   :  { %v2077_v52 = vadd.f32 %v2076_v44, %v1921_v51 }
 0x701   :  { %2102 = vst [vmem:[%s3453_s3] sm:$0xff] %v2042_v12 }
 0x702   :  { %2103 = vst [vmem:[%s3453_s3 + $0x8] sm:$0xff] %v2077_v52 }
 0x704   :  { %v2064_v36 = vpop.f32.mrf.mxu2 }
 0x706   :  { %v2043_v10 = vpop.f32.mrf.mxu0 }
 0x707   :  { %v2044_v25 = vadd.f32 %v2043_v10, %v1926_v24  ;;  %v2078_v30 = vpop.f32.mrf.mxu1 }
 0x708   :  { %v2079_v57 = vadd.f32 %v2078_v30, %v1926_v24 }
 0x709   :  { %2104 = vst [vmem:[%s3453_s3 + $0x10] sm:$0xf] %v2044_v25 }
 0x70a   :  { %2105 = vst [vmem:[%s3453_s3 + $0x18] sm:$0xf] %v2079_v57 }
 0x70c   :  { %v2065_v33 = vpop.f32.mrf.mxu2 }
 0x70e   :  { %v2046_v13 = vpop.f32.mrf.mxu0 }
 0x70f   :  { %v2081_v28 = vpop.f32.mrf.mxu1 }
 0x716   :  { %v2047_v15 = vpop.f32.mrf.mxu0 }
 0x717   :  { %v2082_v18 = vpop.f32.mrf.mxu1 }
 0x71e   :  { %v2049_v58 = vpop.f32.mrf.mxu0 }
 0x71f   :  { %v2084_v5 = vpop.f32.mrf.mxu1 }
 0x726   :  { %v2050_v48 = vpop.f32.mrf.mxu0 }
 0x727   :  { %v2085_v19 = vpop.f32.mrf.mxu1 }
 0x72e   :  { %v2052_v0 = vpop.f32.mrf.mxu0 }
 0x72f   :  { %v2087_v21 = vpop.f32.mrf.mxu1 }
 0x736   :  { %v2053_v20 = vpop.f32.mrf.mxu0 }
 0x737   :  { %v2088_v7 = vpop.f32.mrf.mxu1 }
 0x73e   :  { %v2055_v42 = vpop.f32.mrf.mxu0 }
 0x73f   :  { %v2090_v6 = vpop.f32.mrf.mxu1 }
 0x746   :  { %v2056_v8 = vpop.f32.mrf.mxu0 }
 0x747   :  { %v2091_v3 = vpop.f32.mrf.mxu1 }
 0x74e   :  { %v2058_v63 = vpop.f32.mrf.mxu0 }
 0x74f   :  { %v2093_v49 = vpop.f32.mrf.mxu1 }
 0x756   :  { %v2059_v56 = vpop.f32.mrf.mxu0 }
 0x757   :  { %v2094_v31 = vpop.f32.mrf.mxu1 }
 0x75e   :  { %v2061_v43 = vpop.f32.mrf.mxu0 }
 0x75f   :  { %v2096_v11 = vpop.f32.mrf.mxu1 }
 0x766   :  { %v2062_v1 = vpop.f32.mrf.mxu0 }
 0x767   :  { %v2097_v50 = vpop.f32.mrf.mxu1 }
 0x76f   :  { %v2099_v61 = vpop.f32.mrf.mxu1 }
 0x777   :  { %v2100_v22 = vpop.f32.mrf.mxu1 }

</bundles_post_ra>
